<compile_context>
chip_gen: v7x
topology: tpu7x:2x2x1
jax: 0.10.0
libtpu: 0.0.40
codegen_flags: <defaults>
</compile_context>

<pallas_src>
import functools

import jax
import jax.numpy as jnp
from jax import lax
from jax.experimental import pallas as pl
from jax.experimental.pallas import tpu as pltpu


# Below this many (seq * batch) elements the fixed pallas_call launch / pipeline-prime
# overhead (~µs) dwarfs the actual work -> let XLA do the tiny reduction.
_SMALL_PROBLEM_ELEMS = 4096


def _round_up(x, m):
    return ((x + m - 1) // m) * m


def _pick_tiles(seq, batch):
    """Lane-dense tiles, <= (1024, 1024) f32 = 4 MiB/block (8 MiB double-buffered).

    - Fits every generation's VMEM (incl. v7x 64 MiB / 32 MiB scoped).
    - >= 2 tiles on the "parallel" batch axis when batch >= 256 so both v7x
      TensorCores get work.
    - seq tiles: full dim when small (always a legal block), else 1024 (multiple of 8)
      with the ragged tail masked in-kernel -> no wrapper padding at all.
    """
    if batch < 128:
        bt = batch                                          # lane dim == full array dim
    else:
        bp = _round_up(batch, 128)
        bt = min(1024, max(128, _round_up(bp // 2, 128)))   # aim for >= 2 batch tiles
        bt = min(bt, bp)
    st = seq if seq <= 1024 else 1024
    return st, bt


def _seq_sum_kernel(x_ref, o_ref, *, seq_len, seq_tile, mask_tail):
    """Sum pre-scaled per-token scalars over the seq (sublane) axis.

    x_ref: (ST, BT) f32 -- seq on sublanes, batch on the 128-lane axis
    o_ref: (1, BT)  f32 -- resident across the seq grid axis -> accumulator
    """
    si = pl.program_id(1)                                   # seq reduction axis (last)

    @pl.when(si == 0)
    def _init():
        o_ref[...] = jnp.zeros_like(o_ref)

    x = x_ref[...]
    if mask_tail:
        # Ragged last seq tile: the wrapper does NOT pad, so rows past the true
        # sequence length contain garbage -> zero them (sum-neutral).
        row = si * seq_tile + lax.broadcasted_iota(jnp.int32, x_ref.shape, 0)
        x = jnp.where(row < seq_len, x, jnp.zeros_like(x))

    # Sublane (XLU) collapse; 1/seq already folded into the values -> plain sum.
    # Kernel is HBM-bandwidth bound, so this is free filler under the DMA.
    o_ref[...] += jnp.sum(x, axis=0, keepdims=True)


def baseline_forward(indices, emb_table, w, b):
    """Equivalent of baseline.forward(x): Linear(mean_seq(Embedding(x))).squeeze().

    indices:   (seq, batch) int32 token ids
    emb_table: (vocab, emb) float32 pretrained embedding vectors
    w:         (emb, 1)     float32 linear weight (transposed vs torch's (1, emb))
    b:         (1,) / (1,1) float32 linear bias
    returns:   (batch,) float32
    """
    seq, batch = indices.shape
    vocab = emb_table.shape[0]

    # Algebraic fold: the rank-1 Linear commutes with the mean over seq, so
    #   out[b] = sum_s tw[idx[s, b]] + bias,   tw = (emb_table @ W) / seq
    # -> per-token traffic is a single f32 scalar instead of an emb-dim row.
    tw = (emb_table @ w).reshape(vocab) * (1.0 / seq)        # (vocab,) f32
    bias = jnp.reshape(b, ())

    # TODO(synk): fuse this scalar gather into the kernel (indices as a tiled int32
    # input, tw VMEM/SMEM-resident) once Mosaic's in-kernel arbitrary-index gather is
    # portable across vocab sizes; that would cut kernel HBM traffic another ~2x.
    gathered = jnp.take(tw, indices, axis=0)                 # (seq, batch) f32

    if seq * batch < _SMALL_PROBLEM_ELEMS:
        # Small-problem bypass: pallas launch overhead would dominate the work.
        return jnp.sum(gathered, axis=0) + bias

    st, bt = _pick_tiles(seq, batch)
    grid_b = pl.cdiv(batch, bt)                              # "parallel" (megacore)
    grid_s = pl.cdiv(seq, st)                                # "arbitrary" (reduction)
    batch_pad = grid_b * bt                                  # lane-dense output slab

    out = pl.pallas_call(
        functools.partial(_seq_sum_kernel, seq_len=seq, seq_tile=st,
                          mask_tail=(seq % st != 0)),
        out_shape=jax.ShapeDtypeStruct((1, batch_pad), jnp.float32),
        grid=(grid_b, grid_s),
        in_specs=[pl.BlockSpec((st, bt), lambda bi, si: (si, bi))],
        out_specs=pl.BlockSpec((1, bt), lambda bi, si: (0, bi)),
        compiler_params=pltpu.CompilerParams(
            dimension_semantics=("parallel", "arbitrary"),
            vmem_limit_bytes=32 * 1024 * 1024),
    )(gathered)

    # Bias added once here (cheaper than an extra RMW of the output block on the last
    # grid step); garbage padded batch lanes are sliced off.
    return out[0, :batch] + bias


if __name__ == "__main__":
    key = jax.random.PRNGKey(0)
    k_vec, k_w, k_b, k_idx1, k_idx2 = jax.random.split(key, 5)

    def reference(indices, emb_table, w, b):
        # Pure-JAX reference: embed -> mean(dim 0) -> linear  (same as torch forward).
        emb_x = jnp.take(emb_table, indices, axis=0)         # (seq, batch, emb)
        return (jnp.mean(emb_x, axis=0) @ w + jnp.reshape(b, ())).reshape(-1)

    # ---- Case 1: tiny module-style shapes (exercises the small-problem bypass) ----
    vocab, emb, seq, batch = 100, 32, 8, 2
    emb_table = jax.random.normal(k_vec, (vocab, emb), dtype=jnp.float32)
    w = jax.random.normal(k_w, (emb, 1), dtype=jnp.float32) * 0.1
    b = jax.random.normal(k_b, (1,), dtype=jnp.float32) * 0.1
    idx = jax.random.randint(k_idx1, (seq, batch), 0, vocab, dtype=jnp.int32)

    out = jax.block_until_ready(baseline_forward(idx, emb_table, w, b))
    ref = reference(idx, emb_table, w, b)
    assert out.shape == (batch,)
    assert jnp.allclose(out, ref, atol=5e-5, rtol=1e-3), (out, ref)

    # ---- Case 2: shapes exercising the Pallas kernel path: multi-step seq reduction,
    # ragged seq/batch tiles (no wrapper pad), 2 tiles on the parallel batch axis ----
    vocab2, emb2, seq2, batch2 = 1000, 64, 1500, 150
    emb_table2 = jax.random.normal(k_vec, (vocab2, emb2), dtype=jnp.float32)
    w2 = jax.random.normal(k_w, (emb2, 1), dtype=jnp.float32) * 0.1
    b2 = jax.random.normal(k_b, (1,), dtype=jnp.float32) * 0.1
    idx2 = jax.random.randint(k_idx2, (seq2, batch2), 0, vocab2, dtype=jnp.int32)

    out2 = jax.block_until_ready(baseline_forward(idx2, emb_table2, w2, b2))
    ref2 = reference(idx2, emb_table2, w2, b2)
    assert out2.shape == (batch2,)
    assert jnp.allclose(out2, ref2, atol=5e-5, rtol=1e-3), (out2, ref2)

    print("KERNEL_OK")
</pallas_src>

<mosaic_0001>
module attributes {stable_mosaic.version = 11 : i64} {
  func.func @_seq_sum_kernel(%arg0: i32, %arg1: i32, %arg2: memref<1024x128xf32, #tpu.memory_space<vmem>>, %arg3: memref<1x128xf32, #tpu.memory_space<vmem>>) attributes {dimension_semantics = [#tpu.dimension_semantics<parallel>, #tpu.dimension_semantics<arbitrary>], iteration_bounds = array<i64: 2, 2>, scalar_prefetch = 0 : i64, scratch_operands = 0 : i64, tpu.core_type = #tpu.core_type<tc>, window_params = [{transform_indices = @transform_0, window_bounds = array<i64: 1024, 128>}, {transform_indices = @transform_1, window_bounds = array<i64: 1, 128>}]} {
    %c0_i32 = arith.constant 0 : i32
    %0 = arith.cmpi eq, %arg1, %c0_i32 : i32
    %1 = arith.extui %0 : i1 to i32
    %c0_i32_0 = arith.constant 0 : i32
    %2 = arith.cmpi ne, %1, %c0_i32_0 : i32
    scf.if %2 {
      %cst_7 = arith.constant 0.000000e+00 : f32
      %17 = vector.broadcast %cst_7 : f32 to vector<1x128xf32>
      %c0_8 = arith.constant 0 : index
      %c0_9 = arith.constant 0 : index
      %18 = vector.load %arg3[%c0_8, %c0_9] : memref<1x128xf32, #tpu.memory_space<vmem>>, vector<1x128xf32>
      tpu.vector_store %arg3[%c0_8, %c0_9], %17 {strides = array<i32>} : memref<1x128xf32, #tpu.memory_space<vmem>>, vector<1x128xf32>,
    } else {
    }
    %c0 = arith.constant 0 : index
    %c0_1 = arith.constant 0 : index
    %3 = vector.load %arg2[%c0, %c0_1] : memref<1024x128xf32, #tpu.memory_space<vmem>>, vector<1024x128xf32>
    %c1024_i32 = arith.constant 1024 : i32
    %4 = arith.muli %arg1, %c1024_i32 : i32
    %5 = tpu.iota {dimensions = array<i32: 0>} : vector<1024x128xi32>
    %6 = vector.broadcast %4 : i32 to vector<1024x128xi32>
    %7 = arith.addi %6, %5 : vector<1024x128xi32>
    %c1500_i32 = arith.constant 1500 : i32
    %8 = vector.broadcast %c1500_i32 : i32 to vector<1024x128xi32>
    %9 = arith.cmpi slt, %7, %8 : vector<1024x128xi32>
    %cst = arith.constant 0.000000e+00 : f32
    %10 = vector.broadcast %cst : f32 to vector<1024x128xf32>
    %11 = arith.select %9, %3, %10 : vector<1024x128xi1>, vector<1024x128xf32>
    %c0_2 = arith.constant 0 : index
    %c0_3 = arith.constant 0 : index
    %12 = vector.load %arg3[%c0_2, %c0_3] : memref<1x128xf32, #tpu.memory_space<vmem>>, vector<1x128xf32>
    %cst_4 = arith.constant dense<0.000000e+00> : vector<128xf32>
    %13 = vector.multi_reduction <add>, %11, %cst_4 [0] : vector<1024x128xf32> to vector<128xf32>
    %14 = vector.shape_cast %13 : vector<128xf32> to vector<1x128xf32>
    %15 = arith.addf %12, %14 : vector<1x128xf32>
    %c0_5 = arith.constant 0 : index
    %c0_6 = arith.constant 0 : index
    %16 = vector.load %arg3[%c0_5, %c0_6] : memref<1x128xf32, #tpu.memory_space<vmem>>, vector<1x128xf32>
    tpu.vector_store %arg3[%c0_5, %c0_6], %15 {strides = array<i32>} : memref<1x128xf32, #tpu.memory_space<vmem>>, vector<1x128xf32>,
    return
  }
  func.func @transform_0(%arg0: i32, %arg1: i32) -> (i32, i32) {
    %c0_i32 = arith.constant 0 : i32
    return %arg1, %arg0 : i32, i32
  }
  func.func @transform_1(%arg0: i32, %arg1: i32) -> (i32, i32) {
    %c0_i32 = arith.constant 0 : i32
    %c0_i32_0 = arith.constant 0 : i32
    return %c0_i32, %arg0 : i32, i32
  }
}

</mosaic_0001>

<bundles_post_ra>
// kernel: tpu_custom_call.1
= control target key start
LH: loop header
LB: loop body
LE: loop exit
PB: predicated region body
PF: predicated region fallthrough
CT: control target
= control target key end

     0   :  { %s3121_s0 = inlined_call_operand.vmem [shape: f32[1500,150], index: 0, kind: input, shape index: {}]   ;;  %s3122_s1 = inlined_call_operand.hbm [shape: f32[1,256], index: 1, kind: output, shape index: {}]  }
   0x1   :  { %3126 = sst [smem:[#allocation62_spill]] %s3121_s0 }
   0x2   :  { %6 = vsyncpa [#allocation4], 0 }
   0x3   :  { %8 = vsyncpa [#allocation4 + $0x1], 0  ;;  %s1785_s6 = smov 0   ;;  %s1787_s7 = smov 0  }
   0x4   :  { %s1789_s8 = smov 0   ;;  %s1791_s9 = smov 0  }
   0x5   :  { %s1793_s10 = smov 0   ;;  %s1795_s11 = smov 0  }
   0x6   :  { %s1797_s12 = smov 0   ;;  %s1799_s13 = smov 0  }
   0x7   :  { %s1801_s14 = smov 0   ;;  %s1803_s15 = smov 0  }
   0x8 LB: > { %s1415_s16 = sadd.s32 4294967295, %s1739_s15   ;;  %s1416_s17 = sadd.s32 4294967294, %s1739_s15   ;;  %s1739_s15 = sphi %s1803_s15, %s14_s15   ;;  %s1735_s14 = sphi %s1801_s14, %s3322_s14   ;;  %s1731_s13 = sphi %s1799_s13, %s3321_s13   ;;  %s1727_s12 = sphi %s1797_s12, %s3320_s12   ;;  %s1723_s11 = sphi %s1795_s11, %s3319_s11   ;;  %s1719_s10 = sphi %s1793_s10, %s3318_s10   ;;  %s1715_s9 = sphi %s1791_s9, %s3317_s9   ;;  %s1711_s8 = sphi %s1789_s8, %s3316_s8   ;;  %s1707_s7 = sphi %s1787_s7, %s3315_s7   ;;  %s1703_s6 = sphi %s1785_s6, %s3314_s6  }
   0x9   : > { %s23_s18 = sadd.s32 1, %s1731_s13  ;;  %s26_s19 = sadd.s32 1, %s1735_s14 }
   0xa   : > { %p24_p0 = scmp.ge.s32.totalorder %s23_s18, 2  ;;  %s35_s20 = sadd.s32 1, %s1719_s10 }
   0xb   : > { %p42_p1 = scmp.ne.s32.totalorder %s1719_s10, %s1715_s9  ;;  %p43_p2 = scmp.eq.s32.totalorder %s1739_s15, 0 }
   0xc   : > { %s3324_s18 = smov (%p24_p0, %s23_s18), 0  ;;  %s3326_s19 = smov (!%p24_p0, %s26_s19), %s1735_s14 }
   0xd   : > { %s30_s21 = ssub.s32 %s1731_s13, %s3324_s18  ;;  %p1848_p3 = por %p43_p2, %p42_p1 }
   0xe   : > { %p28_p4 = scmp.ge.s32.totalorder %s3326_s19, 2  ;;  %s61_s23 = sadd.s32 1, %s1711_s8 }
   0xf   : > { %p71_p5 = scmp.ne.s32.totalorder %s1711_s8, %s1707_s7  ;;  %p72_p6 = scmp.eq.s32.totalorder %s1415_s16, 3 }
  0x10   : > { %s3328_s19 = smov (%p28_p4, %s3326_s19), 0  ;;  %p77_p8 = scmp.ne.s32.totalorder %s1707_s7, %s1703_s6 }
  0x11   : > { %3128 = sst [smem:[#allocation6_spill]] %s3328_s19  ;;  %p1857_p7 = por %p72_p6, %p71_p5 }
  0x12   : > { %s31_s25 = ssub.s32 %s1735_s14, %s3328_s19  ;;  %p78_p9 = scmp.eq.s32.totalorder %s1416_s17, 3 }
  0x13   : > { %s32_s26 = sor.u32 %s31_s25, %s30_s21  ;;  %p59_p10 = scmp.eq.s32.totalorder %s31_s25, 0 }
  0x14   : > { %p33_p11 = scmp.eq.s32.totalorder %s32_s26, 0  ;;  %p1865_p12 = por %p78_p9, %p77_p8 }
  0x15   : > { %s1870_s28 = scalar_select %p59_p10, %s1711_s8, %s61_s23  }
  0x16   : > { %s1873_s29 = scalar_select %p33_p11, %s1719_s10, %s35_s20  }
  0x17   : > { %p1418_p13 = scmp.ge.s32.totalorder %s1739_s15, 4 }
  0x19   : > { %94 = sbr.rel (%p1418_p13) target bundleno = 111 (0x6f), region = 16 }
  0x20   : > { %97 = sbr.rel (!%p1848_p3) target bundleno = 111 (0x6f), region = 20  ;;  %s99_s30 = sand.u32 (%p1848_p3), 1, %s1719_s10  }
  0x21   : > { %s1420_s2 = sshll.u32 (%p1848_p3), %s1731_s13, 7  ;;  %s1419_s3 = sshll.u32 (%p1848_p3), %s99_s30, 10 }
  0x22   : > { %s103_s4 = ssub.s32 (%p1848_p3), 188, %s1420_s2  ;;  %s1442_s5 = sshll.u32 (%p1848_p3), %s1731_s13, 8 }
  0x23   : > { %p104_p0 = scmp.lt.s32.totalorder (%p1848_p3), %s103_s4, 128  ;;  %s109_s16 = sadd.s32 (%p1848_p3), %s1735_s14, %s1442_s5 }
  0x24   : > { %s1424_s20 = sshll.u32 (%p1848_p3), %s109_s16, 3  ;;  %s3131_s0 = sld [smem:[#allocation62_spill]] (%p1848_p3) }
  0x25   : > { %s1890_s25 = scalar_lea.vmem (%p1848_p3), [#allocation2], %s1419_s3  }
  0x27   : > { %s3330_s4 = smov (!%p104_p0, %s103_s4), 128 }
  0x28   : > { %s1421_s17 = sshll.u32 %s3330_s4, 7 }
  0x29   : > { %p1425_p1 = scmp.eq.s32.totalorder %s1421_s17, 0 }
  0x2a   : > { %s1888_s22 = scalar_lea.vmem %s3131_s0, %s1424_s20   ;;  %s1893_s26 = sshrl.u32 (!%p1425_p1), %s3330_s4, 6 }
  0x2b   : > { %114 = sbr.rel (%p1425_p1) target bundleno = 111 (0x6f), region = 24  ;;  %p1426_p2 = scmp.le.s32.totalorder (!%p1425_p1), %s1893_s26, 0 }
  0x32   : > { %1360 = sbr.rel (%p1426_p2) target bundleno = 90 (0x5a), region = 122  ;;  %s3132_s30 = smov (!%p1426_p2), %s1890_s25 }
  0x33   : > { %s3133_s2 = smov (!%p1426_p2), %s1888_s22  ;;  %s1902_s5 = smov (!%p1426_p2), 0  }
  0x34   : > { %s1904_s16 = smov (!%p1426_p2), 0  }
  0x39 LB: >> { %v302_v0 = vld [vmem:[%s1747_s2] sm:$0xff]  ;;  %v304_v1 = vld [vmem:[%s1747_s2 + $0x10] sm:$0xff]  ;;  %s430_s3 = sadd.s32 1, %s1751_s5  ;;  %s296_s16 = sadd.s32 1, %s1755_s16   ;;  %s1755_s16 = sphi %s1904_s16, %s296_s16   ;;  %s1751_s5 = sphi %s1902_s5, %s3136_s5   ;;  %s1747_s2 = sphi %s3133_s2, %s3135_s2   ;;  %s1743_s30 = sphi %s3132_s30, %s3134_s30  }
  0x3a   : >> { %v306_v2 = vld [vmem:[%s1747_s2 + $0x20] sm:$0xff]  ;;  %303 = vst [vmem:[%s1743_s30] sm:$0xff] %v302_v0  ;;  %305 = vst [vmem:[%s1743_s30 + $0x8] sm:$0xff] %v304_v1  ;;  %v308_v3 = vld [vmem:[%s1747_s2 + $0x30] sm:$0xff]  ;;  %p431_p3 = scmp.ge.s32.totalorder %s430_s3, %s1893_s26  ;;  %p295_p4 = scmp.ge.s32.totalorder %s296_s16, %s1893_s26 }
  0x3b   : >> { %307 = vst [vmem:[%s1743_s30 + $0x10] sm:$0xff] %v306_v2  ;;  %v310_v4 = vld [vmem:[%s1747_s2 + $0x40] sm:$0xff]  ;;  %v312_v5 = vld [vmem:[%s1747_s2 + $0x50] sm:$0xff]  ;;  %309 = vst [vmem:[%s1743_s30 + $0x18] sm:$0xff] %v308_v3 }
  0x3c   : >> { %311 = vst [vmem:[%s1743_s30 + $0x20] sm:$0xff] %v310_v4  ;;  %313 = vst [vmem:[%s1743_s30 + $0x28] sm:$0xff] %v312_v5  ;;  %v314_v6 = vld [vmem:[%s1747_s2 + $0x60] sm:$0xff]  ;;  %v316_v7 = vld [vmem:[%s1747_s2 + $0x70] sm:$0xff]  ;;  %s3332_s3 = smov (%p431_p3, %s430_s3), 0 }
  0x3d   : >> { %v318_v8 = vld [vmem:[%s1747_s2 + $0x80] sm:$0xff]  ;;  %315 = vst [vmem:[%s1743_s30 + $0x30] sm:$0xff] %v314_v6  ;;  %317 = vst [vmem:[%s1743_s30 + $0x38] sm:$0xff] %v316_v7  ;;  %v320_v9 = vld [vmem:[%s1747_s2 + $0x90] sm:$0xff]  ;;  %s1427_s17 = sshll.u32 %s3332_s3, 10  ;;  %s1428_s20 = sshll.u32 %s3332_s3, 9 }
  0x3e   : >> { %319 = vst [vmem:[%s1743_s30 + $0x40] sm:$0xff] %v318_v8  ;;  %v322_v10 = vld [vmem:[%s1747_s2 + $0xa0] sm:$0xff]  ;;  %v324_v11 = vld [vmem:[%s1747_s2 + $0xb0] sm:$0xff]  ;;  %321 = vst [vmem:[%s1743_s30 + $0x48] sm:$0xff] %v320_v9  ;;  %s1961_s21 = scalar_lea.vmem %s1888_s22, %s1427_s17   ;;  %s1964_s23 = scalar_lea.vmem %s1890_s25, %s1428_s20 [#allocation2]  }
  0x3f   : >> { %323 = vst [vmem:[%s1743_s30 + $0x50] sm:$0xff] %v322_v10  ;;  %325 = vst [vmem:[%s1743_s30 + $0x58] sm:$0xff] %v324_v11  ;;  %v326_v12 = vld [vmem:[%s1747_s2 + $0xc0] sm:$0xff]  ;;  %v328_v13 = vld [vmem:[%s1747_s2 + $0xd0] sm:$0xff]  ;;  %s3136_s5 = smov %s3332_s3 }
  0x40   : >> { %v330_v14 = vld [vmem:[%s1747_s2 + $0xe0] sm:$0xff]  ;;  %327 = vst [vmem:[%s1743_s30 + $0x60] sm:$0xff] %v326_v12  ;;  %329 = vst [vmem:[%s1743_s30 + $0x68] sm:$0xff] %v328_v13  ;;  %v332_v15 = vld [vmem:[%s1747_s2 + $0xf0] sm:$0xff] }
  0x41   : >> { %331 = vst [vmem:[%s1743_s30 + $0x70] sm:$0xff] %v330_v14  ;;  %v334_v16 = vld [vmem:[%s1747_s2 + $0x100] sm:$0xff]  ;;  %v336_v17 = vld [vmem:[%s1747_s2 + $0x110] sm:$0xff]  ;;  %333 = vst [vmem:[%s1743_s30 + $0x78] sm:$0xff] %v332_v15 }
  0x42   : >> { %335 = vst [vmem:[%s1743_s30 + $0x80] sm:$0xff] %v334_v16  ;;  %337 = vst [vmem:[%s1743_s30 + $0x88] sm:$0xff] %v336_v17  ;;  %v338_v18 = vld [vmem:[%s1747_s2 + $0x120] sm:$0xff]  ;;  %v340_v19 = vld [vmem:[%s1747_s2 + $0x130] sm:$0xff] }
  0x43   : >> { %v342_v20 = vld [vmem:[%s1747_s2 + $0x140] sm:$0xff]  ;;  %339 = vst [vmem:[%s1743_s30 + $0x90] sm:$0xff] %v338_v18  ;;  %341 = vst [vmem:[%s1743_s30 + $0x98] sm:$0xff] %v340_v19  ;;  %v344_v21 = vld [vmem:[%s1747_s2 + $0x150] sm:$0xff] }
  0x44   : >> { %343 = vst [vmem:[%s1743_s30 + $0xa0] sm:$0xff] %v342_v20  ;;  %v346_v22 = vld [vmem:[%s1747_s2 + $0x160] sm:$0xff]  ;;  %v348_v23 = vld [vmem:[%s1747_s2 + $0x170] sm:$0xff]  ;;  %345 = vst [vmem:[%s1743_s30 + $0xa8] sm:$0xff] %v344_v21 }
  0x45   : >> { %347 = vst [vmem:[%s1743_s30 + $0xb0] sm:$0xff] %v346_v22  ;;  %349 = vst [vmem:[%s1743_s30 + $0xb8] sm:$0xff] %v348_v23  ;;  %v350_v24 = vld [vmem:[%s1747_s2 + $0x180] sm:$0xff]  ;;  %v352_v25 = vld [vmem:[%s1747_s2 + $0x190] sm:$0xff] }
  0x46   : >> { %v354_v26 = vld [vmem:[%s1747_s2 + $0x1a0] sm:$0xff]  ;;  %351 = vst [vmem:[%s1743_s30 + $0xc0] sm:$0xff] %v350_v24  ;;  %353 = vst [vmem:[%s1743_s30 + $0xc8] sm:$0xff] %v352_v25  ;;  %v356_v27 = vld [vmem:[%s1747_s2 + $0x1b0] sm:$0xff] }
  0x47   : >> { %355 = vst [vmem:[%s1743_s30 + $0xd0] sm:$0xff] %v354_v26  ;;  %v358_v28 = vld [vmem:[%s1747_s2 + $0x1c0] sm:$0xff]  ;;  %v360_v29 = vld [vmem:[%s1747_s2 + $0x1d0] sm:$0xff]  ;;  %357 = vst [vmem:[%s1743_s30 + $0xd8] sm:$0xff] %v356_v27 }
  0x48   : >> { %359 = vst [vmem:[%s1743_s30 + $0xe0] sm:$0xff] %v358_v28  ;;  %361 = vst [vmem:[%s1743_s30 + $0xe8] sm:$0xff] %v360_v29  ;;  %v362_v30 = vld [vmem:[%s1747_s2 + $0x1e0] sm:$0xff]  ;;  %v364_v31 = vld [vmem:[%s1747_s2 + $0x1f0] sm:$0xff] }
  0x49   : >> { %v366_v32 = vld [vmem:[%s1747_s2 + $0x200] sm:$0xff]  ;;  %363 = vst [vmem:[%s1743_s30 + $0xf0] sm:$0xff] %v362_v30  ;;  %365 = vst [vmem:[%s1743_s30 + $0xf8] sm:$0xff] %v364_v31  ;;  %v368_v33 = vld [vmem:[%s1747_s2 + $0x210] sm:$0xff] }
  0x4a   : >> { %367 = vst [vmem:[%s1743_s30 + $0x100] sm:$0xff] %v366_v32  ;;  %v370_v34 = vld [vmem:[%s1747_s2 + $0x220] sm:$0xff]  ;;  %v372_v35 = vld [vmem:[%s1747_s2 + $0x230] sm:$0xff]  ;;  %369 = vst [vmem:[%s1743_s30 + $0x108] sm:$0xff] %v368_v33 }
  0x4b   : >> { %371 = vst [vmem:[%s1743_s30 + $0x110] sm:$0xff] %v370_v34  ;;  %373 = vst [vmem:[%s1743_s30 + $0x118] sm:$0xff] %v372_v35  ;;  %v374_v36 = vld [vmem:[%s1747_s2 + $0x240] sm:$0xff]  ;;  %v376_v37 = vld [vmem:[%s1747_s2 + $0x250] sm:$0xff] }
  0x4c   : >> { %v378_v38 = vld [vmem:[%s1747_s2 + $0x260] sm:$0xff]  ;;  %375 = vst [vmem:[%s1743_s30 + $0x120] sm:$0xff] %v374_v36  ;;  %377 = vst [vmem:[%s1743_s30 + $0x128] sm:$0xff] %v376_v37  ;;  %v380_v39 = vld [vmem:[%s1747_s2 + $0x270] sm:$0xff] }
  0x4d   : >> { %379 = vst [vmem:[%s1743_s30 + $0x130] sm:$0xff] %v378_v38  ;;  %v382_v40 = vld [vmem:[%s1747_s2 + $0x280] sm:$0xff]  ;;  %v384_v41 = vld [vmem:[%s1747_s2 + $0x290] sm:$0xff]  ;;  %381 = vst [vmem:[%s1743_s30 + $0x138] sm:$0xff] %v380_v39 }
  0x4e   : >> { %383 = vst [vmem:[%s1743_s30 + $0x140] sm:$0xff] %v382_v40  ;;  %385 = vst [vmem:[%s1743_s30 + $0x148] sm:$0xff] %v384_v41  ;;  %v386_v42 = vld [vmem:[%s1747_s2 + $0x2a0] sm:$0xff]  ;;  %v388_v43 = vld [vmem:[%s1747_s2 + $0x2b0] sm:$0xff] }
  0x4f   : >> { %v390_v44 = vld [vmem:[%s1747_s2 + $0x2c0] sm:$0xff]  ;;  %387 = vst [vmem:[%s1743_s30 + $0x150] sm:$0xff] %v386_v42  ;;  %389 = vst [vmem:[%s1743_s30 + $0x158] sm:$0xff] %v388_v43  ;;  %v392_v45 = vld [vmem:[%s1747_s2 + $0x2d0] sm:$0xff] }
  0x50   : >> { %391 = vst [vmem:[%s1743_s30 + $0x160] sm:$0xff] %v390_v44  ;;  %v394_v46 = vld [vmem:[%s1747_s2 + $0x2e0] sm:$0xff]  ;;  %v396_v47 = vld [vmem:[%s1747_s2 + $0x2f0] sm:$0xff]  ;;  %393 = vst [vmem:[%s1743_s30 + $0x168] sm:$0xff] %v392_v45 }
  0x51   : >> { %395 = vst [vmem:[%s1743_s30 + $0x170] sm:$0xff] %v394_v46  ;;  %397 = vst [vmem:[%s1743_s30 + $0x178] sm:$0xff] %v396_v47  ;;  %v398_v48 = vld [vmem:[%s1747_s2 + $0x300] sm:$0xff]  ;;  %v400_v49 = vld [vmem:[%s1747_s2 + $0x310] sm:$0xff] }
  0x52   : >> { %v402_v50 = vld [vmem:[%s1747_s2 + $0x320] sm:$0xff]  ;;  %399 = vst [vmem:[%s1743_s30 + $0x180] sm:$0xff] %v398_v48  ;;  %401 = vst [vmem:[%s1743_s30 + $0x188] sm:$0xff] %v400_v49  ;;  %v404_v51 = vld [vmem:[%s1747_s2 + $0x330] sm:$0xff] }
  0x53   : >> { %403 = vst [vmem:[%s1743_s30 + $0x190] sm:$0xff] %v402_v50  ;;  %v406_v52 = vld [vmem:[%s1747_s2 + $0x340] sm:$0xff]  ;;  %v408_v53 = vld [vmem:[%s1747_s2 + $0x350] sm:$0xff]  ;;  %405 = vst [vmem:[%s1743_s30 + $0x198] sm:$0xff] %v404_v51  ;;  %298 = sbr.rel (!%p295_p4) target bundleno = 57 (0x39), region = 128 }
  0x54   : >> { %407 = vst [vmem:[%s1743_s30 + $0x1a0] sm:$0xff] %v406_v52  ;;  %409 = vst [vmem:[%s1743_s30 + $0x1a8] sm:$0xff] %v408_v53  ;;  %v410_v54 = vld [vmem:[%s1747_s2 + $0x360] sm:$0xff]  ;;  %v412_v55 = vld [vmem:[%s1747_s2 + $0x370] sm:$0xff] }
  0x55   : >> { %v414_v56 = vld [vmem:[%s1747_s2 + $0x380] sm:$0xff]  ;;  %411 = vst [vmem:[%s1743_s30 + $0x1b0] sm:$0xff] %v410_v54  ;;  %413 = vst [vmem:[%s1743_s30 + $0x1b8] sm:$0xff] %v412_v55  ;;  %v416_v57 = vld [vmem:[%s1747_s2 + $0x390] sm:$0xff] }
  0x56   : >> { %415 = vst [vmem:[%s1743_s30 + $0x1c0] sm:$0xff] %v414_v56  ;;  %v418_v58 = vld [vmem:[%s1747_s2 + $0x3a0] sm:$0xff]  ;;  %v420_v59 = vld [vmem:[%s1747_s2 + $0x3b0] sm:$0xff]  ;;  %417 = vst [vmem:[%s1743_s30 + $0x1c8] sm:$0xff] %v416_v57 }
  0x57   : >> { %419 = vst [vmem:[%s1743_s30 + $0x1d0] sm:$0xff] %v418_v58  ;;  %421 = vst [vmem:[%s1743_s30 + $0x1d8] sm:$0xff] %v420_v59  ;;  %v422_v60 = vld [vmem:[%s1747_s2 + $0x3c0] sm:$0xff]  ;;  %v424_v61 = vld [vmem:[%s1747_s2 + $0x3d0] sm:$0xff] }
  0x58   : >> { %v426_v62 = vld [vmem:[%s1747_s2 + $0x3e0] sm:$0xff]  ;;  %423 = vst [vmem:[%s1743_s30 + $0x1e0] sm:$0xff] %v422_v60  ;;  %425 = vst [vmem:[%s1743_s30 + $0x1e8] sm:$0xff] %v424_v61  ;;  %v428_v63 = vld [vmem:[%s1747_s2 + $0x3f0] sm:$0xff]  ;;  %s3135_s2 = smov %s1961_s21 }
  0x59   : >> { %427 = vst [vmem:[%s1743_s30 + $0x1f0] sm:$0xff] %v426_v62  ;;  %429 = vst [vmem:[%s1743_s30 + $0x1f8] sm:$0xff] %v428_v63  ;;  %s3134_s30 = smov %s1964_s23 }
  0x5a PF: > { %s2069_s17 = sand.u32 63, %s3330_s4   ;;  %s1443_s20 = sshll.u32 %s1893_s26, 10 }
  0x5b   : > { %s2073_s0 = scalar_lea.vmem %s1888_s22, %s1443_s20   ;;  %s1444_s19 = sshll.u32 %s1893_s26, 9 }
  0x5c   : > { %s443_s23 = scalar_lea.vmem %s1890_s25, %s1444_s19 [#allocation2]   ;;  %p1432_p5 = scmp.le.s32.totalorder %s2069_s17, 0 }
  0x5d   : > { %s1757_s3 = smov (!%p1432_p5), %s443_s23   ;;  %s1761_s16 = smov (!%p1432_p5), %s2073_s0  }
  0x5e   : > { %1374 = sbr.rel (%p1432_p5) target bundleno = 111 (0x6f), region = 133  ;;  %s1765_s21 = smov (!%p1432_p5), 0  }
  0x5f   : > { %s1769_s30 = smov (!%p1432_p5), 0  }
  0x65 LB: >> { %v453_v0 = vld [vmem:[%s1763_s16] sm:$0xff]  ;;  %s455_s4 = sadd.s32 1, %s1767_s21  ;;  %s447_s30 = sadd.s32 1, %s1771_s30   ;;  %s1771_s30 = sphi %s1769_s30, %s447_s30   ;;  %s1767_s21 = sphi %s1765_s21, %s1766_s21   ;;  %s1763_s16 = sphi %s1761_s16, %s460_s16   ;;  %s1759_s3 = sphi %s1757_s3, %s461_s3  }
  0x66   : >> { %454 = vst [vmem:[%s1759_s3] sm:$0xff] %v453_v0  ;;  %p456_p6 = scmp.ge.s32.totalorder %s455_s4, %s2069_s17  ;;  %p446_p8 = scmp.ge.s32.totalorder %s447_s30, %s2069_s17 }
  0x68   : >> { %s3334_s4 = smov (%p456_p6, %s455_s4), 0  ;;  %449 = sbr.rel (!%p446_p8) target bundleno = 101 (0x65), region = 139 }
  0x69   : >> { %s1433_s19 = sshll.u32 %s3334_s4, 4  ;;  %s1434_s22 = sshll.u32 %s3334_s4, 3 }
  0x6a   : >> { %s460_s16 = scalar_lea.vmem %s2073_s0, %s1433_s19   ;;  %s461_s3 = scalar_lea.vmem %s443_s23, %s1434_s22 [#allocation2]  }
  0x6b   : >> { %s1766_s21 = smov %s3334_s4  }
  0x6f PF: > { %p1435_p9 = scmp.ge.s32.totalorder %s1739_s15, 1  ;;  %p466_p10 = scmp.lt.s32.totalorder %s1739_s15, 5 }
  0x71   : > { %p467_p11 = pnand %p1435_p9, %p466_p10 }
  0x73   : > { %470 = sbr.rel (%p467_p11) target bundleno = 492 (0x1ec), region = 72 }
  0x7a   : > { %s473_s25 = sand.u32 1, %s1715_s9   ;;  %s489_s26 = sand.u32 1, %s1707_s7  }
  0x7b   : > { %s1436_s2 = sshll.u32 %s473_s25, 10  ;;  %s2090_s20 = scalar_lea.vmem [#allocation3], %s489_s26 }
  0x7c   : > { %s2086_s5 = scalar_lea.vmem [#allocation2], %s1436_s2  ;;  %p1437_p13 = scmp.ne.s32.totalorder %s1723_s11, 0 }
  0x7d   : > { %v1773_v1 = vmov (!%p1437_p13), 0.0  }
  0x7e   : > { %499 = sbr.rel (%p1437_p13) target bundleno = 133 (0x85), region = 80  ;;  %500 = vst [vmem:[%s2090_s20] sm:$0x1] (!%p1437_p13), %v1773_v1 }
  0x85 PF: > { %v630_v2 = vlaneseq  ;;  %s1438_s0 = sshll.u32 %s1723_s11, 10  ;;  %s1439_s9 = sshll.u32 %s1727_s12, 4 }
  0x86   : > { %v2103_v6 = vstv %s1438_s0  ;;  %s1293_s11 = sshll.u32 %s2090_s20, 4  ;;  %s3059_s3 = scalar_lea.hbm %s3122_s1, %s1439_s9  ;;  %s3061_s11 = int_to_ptr.vmem [resolvable:$true] %s1293_s11 }
  0x87   : > { %v2095_v3 = vshrl.u32 %v630_v2, 7  ;;  %s1281_s16 = scalar_lea.sflag [#allocation4], %s489_s26  ;;  %s1597_s21 = scalar_lea.vmem %s3061_s11, 16 }
  0x88   : > { %p1598_p0 = scmp.ne.s32.totalorder %s3061_s11, %s1597_s21  ;;  %s1774_s12 = smov [#allocation3]  }
  0x89   : > { %3137 = vst [vmem:[#allocation7_spill] sm:$0xff] %v2095_v3  ;;  %v2098_v4 = vadd.s32 264, %v2095_v3  ;;  %v2101_v5 = vadd.s32 272, %v2095_v3  ;;  %v2106_v7 = vadd.s32 280, %v2095_v3  ;;  %v2109_v8 = vadd.s32 288, %v2095_v3  ;;  %s1601_s30 = sshll.u32 %s1774_s12, 4  ;;  %s1602_s30 = int_to_ptr.vmem [resolvable:$false] %s1601_s30 }
  0x8a   : > { %v2112_v9 = vadd.s32 296, %v2095_v3  ;;  %v2115_v10 = vadd.s32 304, %v2095_v3  ;;  %v2118_v11 = vadd.s32 312, %v2095_v3  ;;  %v2121_v12 = vadd.s32 320, %v2095_v3  ;;  %p1599_p1 = pnand %p1598_p0, %p1857_p7  ;;  %s1603_s4 = scalar_lea.vmem %s1602_s30, 32 }
  0x8b   : > { %v2124_v13 = vadd.s32 328, %v2095_v3  ;;  %v2127_v14 = vadd.s32 336, %v2095_v3  ;;  %v2130_v15 = vadd.s32 344, %v2095_v3  ;;  %v2133_v16 = vadd.s32 352, %v2095_v3  ;;  %p1604_p3 = scmp.lt.s32.totalorder %s3061_s11, %s1602_s30  ;;  %p1605_p4 = scmp.lt.s32.totalorder %s1603_s4, %s1597_s21 }
  0x8c   : > { %v2136_v17 = vadd.s32 360, %v2095_v3  ;;  %v2139_v18 = vadd.s32 368, %v2095_v3  ;;  %v2142_v19 = vadd.s32 376, %v2095_v3  ;;  %v2145_v20 = vadd.s32 384, %v2095_v3  ;;  %p1600_p2 = pneg %p1599_p1 }
  0x8d   : > { %v2148_v21 = vadd.s32 392, %v2095_v3  ;;  %v2151_v22 = vadd.s32 400, %v2095_v3  ;;  %v2154_v23 = vadd.s32 408, %v2095_v3  ;;  %v2157_v24 = vadd.s32 416, %v2095_v3  ;;  %p1606_p5 = por %p1605_p4, %p1604_p3 }
  0x8e   : > { %v2160_v25 = vadd.s32 424, %v2095_v3  ;;  %v2163_v26 = vadd.s32 432, %v2095_v3  ;;  %v2166_v27 = vadd.s32 440, %v2095_v3  ;;  %v2169_v28 = vadd.s32 448, %v2095_v3 }
  0x8f   : > { %v2172_v29 = vadd.s32 456, %v2095_v3  ;;  %v2175_v30 = vadd.s32 464, %v2095_v3  ;;  %v2178_v31 = vadd.s32 472, %v2095_v3  ;;  %v2181_v32 = vadd.s32 480, %v2095_v3  ;;  %p1607_p6 = pnand %p1606_p5, %p1600_p2 }
  0x90   : > { %v2184_v33 = vadd.s32 488, %v2095_v3  ;;  %v2187_v34 = vadd.s32 496, %v2095_v3  ;;  %v2190_v35 = vadd.s32 504, %v2095_v3  ;;  %v2193_v36 = vadd.s32 512, %v2095_v3 }
  0x91   : > { %v2196_v37 = vadd.s32 520, %v2095_v3  ;;  %v2199_v38 = vadd.s32 528, %v2095_v3  ;;  %v2202_v39 = vadd.s32 536, %v2095_v3  ;;  %v2205_v40 = vadd.s32 544, %v2095_v3 }
  0x92   : > { %v2208_v41 = vadd.s32 552, %v2095_v3  ;;  %v2211_v42 = vadd.s32 560, %v2095_v3  ;;  %v2214_v43 = vadd.s32 568, %v2095_v3  ;;  %v2217_v44 = vadd.s32 576, %v2095_v3 }
  0x93   : > { %v2220_v45 = vadd.s32 584, %v2095_v3  ;;  %v2223_v46 = vadd.s32 592, %v2095_v3  ;;  %v2226_v47 = vadd.s32 600, %v2095_v3  ;;  %v2229_v48 = vadd.s32 608, %v2095_v3 }
  0x94   : > { %v2232_v49 = vadd.s32 616, %v2095_v3  ;;  %v2235_v50 = vadd.s32 624, %v2095_v3  ;;  %v2238_v51 = vadd.s32 632, %v2095_v3  ;;  %v2241_v52 = vadd.s32 640, %v2095_v3 }
  0x95   : > { %v2244_v53 = vadd.s32 648, %v2095_v3  ;;  %v2247_v54 = vadd.s32 656, %v2095_v3  ;;  %v2250_v55 = vadd.s32 664, %v2095_v3  ;;  %v2253_v56 = vadd.s32 672, %v2095_v3 }
  0x96   : > { %v2256_v57 = vadd.s32 680, %v2095_v3  ;;  %v2259_v58 = vadd.s32 688, %v2095_v3  ;;  %v2262_v59 = vadd.s32 696, %v2095_v3  ;;  %v2265_v60 = vadd.s32 704, %v2095_v3 }
  0x97   : > { %v2268_v61 = vadd.s32 712, %v2095_v3  ;;  %v2271_v62 = vadd.s32 720, %v2095_v3  ;;  %v2274_v63 = vadd.s32 728, %v2095_v3  ;;  %v2277_v0 = vadd.s32 736, %v2095_v3 }
  0x98   : > { %3138 = vst [vmem:[#allocation8_spill] sm:$0xff] %v2265_v60  ;;  %v2280_v1 = vadd.s32 744, %v2095_v3  ;;  %v2283_v2 = vadd.s32 752, %v2095_v3  ;;  %v2286_v60 = vadd.s32 760, %v2095_v3 }
  0x99   : > { %3139 = vst [vmem:[#allocation9_spill] sm:$0xff] %v2268_v61  ;;  %3140 = vst [vmem:[#allocation10_spill] sm:$0xff] %v2271_v62  ;;  %v2289_v61 = vadd.s32 768, %v2095_v3  ;;  %v2292_v62 = vadd.s32 776, %v2095_v3 }
  0x9a   : > { %3141 = vst [vmem:[#allocation11_spill] sm:$0xff] %v2274_v63  ;;  %3142 = vst [vmem:[#allocation12_spill] sm:$0xff] %v2277_v0  ;;  %v2295_v63 = vadd.s32 784, %v2095_v3  ;;  %v2298_v0 = vadd.s32 792, %v2095_v3 }
  0x9b   : > { %3143 = vst [vmem:[#allocation13_spill] sm:$0xff] %v2280_v1  ;;  %3144 = vst [vmem:[#allocation14_spill] sm:$0xff] %v2283_v2  ;;  %v2301_v1 = vadd.s32 800, %v2095_v3  ;;  %v2304_v2 = vadd.s32 808, %v2095_v3 }
  0x9c   : > { %3145 = vst [vmem:[#allocation15_spill] sm:$0xff] %v2286_v60  ;;  %3146 = vst [vmem:[#allocation16_spill] sm:$0xff] %v2289_v61  ;;  %v2307_v60 = vadd.s32 816, %v2095_v3  ;;  %v2310_v61 = vadd.s32 824, %v2095_v3 }
  0x9d   : > { %3147 = vst [vmem:[#allocation17_spill] sm:$0xff] %v2292_v62  ;;  %3148 = vst [vmem:[#allocation18_spill] sm:$0xff] %v2295_v63  ;;  %v2313_v62 = vadd.s32 832, %v2095_v3  ;;  %v2316_v63 = vadd.s32 840, %v2095_v3 }
  0x9e   : > { %3149 = vst [vmem:[#allocation19_spill] sm:$0xff] %v2298_v0  ;;  %3150 = vst [vmem:[#allocation20_spill] sm:$0xff] %v2301_v1  ;;  %v2320_v0 = vadd.s32 %v2103_v6, %v2098_v4  ;;  %v2323_v1 = vadd.s32 848, %v2095_v3  ;;  %v2342_v4 = vadd.s32 888, %v2095_v3 }
  0x9f   : > { %3151 = vst [vmem:[#allocation21_spill] sm:$0xff] %v2304_v2  ;;  %3152 = vst [vmem:[#allocation22_spill] sm:$0xff] %v2307_v60  ;;  %v2326_v2 = vadd.s32 856, %v2095_v3  ;;  %v2329_v60 = vadd.s32 864, %v2095_v3 }
  0xa0   : > { %3153 = vst [vmem:[#allocation23_spill] sm:$0xff] %v2310_v61  ;;  %3154 = vst [vmem:[#allocation24_spill] sm:$0xff] %v2313_v62  ;;  %v2333_v61 = vadd.s32 %v2103_v6, %v2101_v5  ;;  %v2336_v62 = vadd.s32 872, %v2095_v3  ;;  %v2355_v5 = vadd.s32 912, %v2095_v3 }
  0xa1   : > { %3155 = vst [vmem:[#allocation25_spill] sm:$0xff] %v2316_v63  ;;  %3156 = vst [vmem:[#allocation26_spill] sm:$0xff] %v2320_v0  ;;  %v2339_v63 = vadd.s32 880, %v2095_v3  ;;  %v2346_v0 = vadd.s32 %v2103_v6, %v2106_v7  ;;  %v2368_v7 = vadd.s32 936, %v2095_v3 }
  0xa2   : > { %3157 = vst [vmem:[#allocation27_spill] sm:$0xff] %v2326_v2  ;;  %3158 = vst [vmem:[#allocation28_spill] sm:$0xff] %v2329_v60  ;;  %v2349_v2 = vadd.s32 896, %v2095_v3  ;;  %v2352_v60 = vadd.s32 904, %v2095_v3 }
  0xa3   : > { %3159 = vst [vmem:[#allocation29_spill] sm:$0xff] %v2333_v61  ;;  %3160 = vst [vmem:[#allocation30_spill] sm:$0xff] %v2339_v63  ;;  %v2359_v61 = vadd.s32 %v2103_v6, %v2109_v8  ;;  %v2362_v63 = vadd.s32 920, %v2095_v3  ;;  %v2380_v8 = vadd.s32 968, %v2095_v3 }
  0xa4   : > { %3161 = vst [vmem:[#allocation31_spill] sm:$0xff] %v2342_v4  ;;  %3162 = vst [vmem:[#allocation32_spill] sm:$0xff] %v2346_v0  ;;  %v2365_v4 = vadd.s32 928, %v2095_v3  ;;  %v2371_v0 = vadd.s32 944, %v2095_v3 }
  0xa5   : > { %3163 = vst [vmem:[#allocation33_spill] sm:$0xff] %v2352_v60  ;;  %3164 = vst [vmem:[#allocation34_spill] sm:$0xff] %v2355_v5  ;;  %v2374_v60 = vadd.s32 952, %v2095_v3  ;;  %v2377_v5 = vadd.s32 960, %v2095_v3 }
  0xa6   : > { %3165 = vst [vmem:[#allocation35_spill] sm:$0xff] %v2359_v61  ;;  %3166 = vst [vmem:[#allocation36_spill] sm:$0xff] %v2365_v4  ;;  %v2383_v61 = vadd.s32 976, %v2095_v3  ;;  %v2386_v4 = vadd.s32 984, %v2095_v3 }
  0xa7   : > { %3167 = vst [vmem:[#allocation37_spill] sm:$0xff] %v2368_v7  ;;  %3168 = vst [vmem:[#allocation38_spill] sm:$0xff] %v2371_v0  ;;  %v2389_v7 = vadd.s32 992, %v2095_v3  ;;  %v2392_v0 = vadd.s32 1000, %v2095_v3 }
  0xa8   : > { %3169 = vst [vmem:[#allocation39_spill] sm:$0xff] %v2374_v60  ;;  %3170 = vst [vmem:[#allocation40_spill] sm:$0xff] %v2377_v5  ;;  %v2395_v60 = vadd.s32 1008, %v2095_v3  ;;  %v2398_v5 = vadd.s32 1016, %v2095_v3  ;;  %v2418_v3 = vadd.s32 %v2103_v6, %v2124_v13  ;;  %v2438_v13 = vadd.s32 %v2103_v6, %v2139_v18 }
  0xa9   : > { %3171 = vst [vmem:[#allocation41_spill] sm:$0xff] %v2380_v8  ;;  %3172 = vst [vmem:[#allocation42_spill] sm:$0xff] %v2383_v61  ;;  %v2402_v8 = vadd.s32 %v2103_v6, %v2112_v9  ;;  %v2406_v61 = vadd.s32 %v2103_v6, %v2115_v10  ;;  %v2422_v9 = vadd.s32 %v2103_v6, %v2127_v14 }
  0xaa   : > { %3173 = vst [vmem:[#allocation43_spill] sm:$0xff] %v2389_v7  ;;  %3174 = vst [vmem:[#allocation44_spill] sm:$0xff] %v2392_v0  ;;  %v2410_v7 = vadd.s32 %v2103_v6, %v2118_v11  ;;  %v2414_v0 = vadd.s32 %v2103_v6, %v2121_v12  ;;  %v2426_v10 = vadd.s32 %v2103_v6, %v2130_v15 }
  0xab   : > { %v2430_v11 = vadd.s32 %v2103_v6, %v2133_v16  ;;  %v2434_v12 = vadd.s32 %v2103_v6, %v2136_v17  ;;  %v2442_v14 = vadd.s32 %v2103_v6, %v2142_v19  ;;  %v2446_v15 = vadd.s32 %v2103_v6, %v2145_v20 }
  0xac   : > { %v2450_v16 = vadd.s32 %v2103_v6, %v2148_v21  ;;  %v2454_v17 = vadd.s32 %v2103_v6, %v2151_v22  ;;  %v2458_v18 = vadd.s32 %v2103_v6, %v2154_v23  ;;  %v2462_v19 = vadd.s32 %v2103_v6, %v2157_v24 }
  0xad   : > { %v2466_v20 = vadd.s32 %v2103_v6, %v2160_v25  ;;  %v2470_v21 = vadd.s32 %v2103_v6, %v2163_v26  ;;  %v2474_v22 = vadd.s32 %v2103_v6, %v2166_v27  ;;  %v2478_v23 = vadd.s32 %v2103_v6, %v2169_v28 }
  0xae   : > { %v2482_v24 = vadd.s32 %v2103_v6, %v2172_v29  ;;  %v2486_v25 = vadd.s32 %v2103_v6, %v2175_v30  ;;  %v2490_v26 = vadd.s32 %v2103_v6, %v2178_v31  ;;  %v2494_v27 = vadd.s32 %v2103_v6, %v2181_v32 }
  0xaf   : > { %v2498_v28 = vadd.s32 %v2103_v6, %v2184_v33  ;;  %v2502_v29 = vadd.s32 %v2103_v6, %v2187_v34  ;;  %v2506_v30 = vadd.s32 %v2103_v6, %v2190_v35  ;;  %v2510_v31 = vadd.s32 %v2103_v6, %v2193_v36 }
  0xb0   : > { %v2514_v32 = vadd.s32 %v2103_v6, %v2196_v37  ;;  %v2518_v33 = vadd.s32 %v2103_v6, %v2199_v38  ;;  %v2522_v34 = vadd.s32 %v2103_v6, %v2202_v39  ;;  %v2526_v35 = vadd.s32 %v2103_v6, %v2205_v40 }
  0xb1   : > { %v2530_v36 = vadd.s32 %v2103_v6, %v2208_v41  ;;  %v2534_v37 = vadd.s32 %v2103_v6, %v2211_v42  ;;  %v2538_v38 = vadd.s32 %v2103_v6, %v2214_v43  ;;  %v2542_v39 = vadd.s32 %v2103_v6, %v2217_v44 }
  0xb2   : > { %v2546_v40 = vadd.s32 %v2103_v6, %v2220_v45  ;;  %v2550_v41 = vadd.s32 %v2103_v6, %v2223_v46  ;;  %v2554_v42 = vadd.s32 %v2103_v6, %v2226_v47  ;;  %v2558_v43 = vadd.s32 %v2103_v6, %v2229_v48 }
  0xb3   : > { %v2562_v44 = vadd.s32 %v2103_v6, %v2232_v49  ;;  %v2566_v45 = vadd.s32 %v2103_v6, %v2235_v50  ;;  %v2570_v46 = vadd.s32 %v2103_v6, %v2238_v51  ;;  %v2574_v47 = vadd.s32 %v2103_v6, %v2241_v52 }
  0xb4   : > { %v2578_v48 = vadd.s32 %v2103_v6, %v2244_v53  ;;  %v2582_v49 = vadd.s32 %v2103_v6, %v2247_v54  ;;  %v2586_v50 = vadd.s32 %v2103_v6, %v2250_v55  ;;  %v2590_v51 = vadd.s32 %v2103_v6, %v2253_v56 }
  0xb5   : > { %3175 = vst [vmem:[#allocation45_spill] sm:$0xff] %v2566_v45  ;;  %3176 = vst [vmem:[#allocation46_spill] sm:$0xff] %v2570_v46  ;;  %v2594_v52 = vadd.s32 %v2103_v6, %v2256_v57  ;;  %v2598_v53 = vadd.s32 %v2103_v6, %v2259_v58  ;;  %v2602_v54 = vadd.s32 %v2103_v6, %v2262_v59 }
  0xb6   : > { %3177 = vst [vmem:[#allocation47_spill] sm:$0xff] %v2574_v47  ;;  %3178 = vst [vmem:[#allocation48_spill] sm:$0xff] %v2578_v48 }
  0xb7   : > { %3179 = vst [vmem:[#allocation49_spill] sm:$0xff] %v2582_v49  ;;  %3180 = vst [vmem:[#allocation50_spill] sm:$0xff] %v2586_v50  ;;  %v3185_v49 = vld [vmem:[#allocation8_spill] sm:$0xff]  ;;  %v3187_v50 = vld [vmem:[#allocation9_spill] sm:$0xff] }
  0xb8   : > { %3181 = vst [vmem:[#allocation51_spill] sm:$0xff] %v2590_v51  ;;  %3182 = vst [vmem:[#allocation52_spill] sm:$0xff] %v2594_v52  ;;  %v2606_v55 = vadd.s32 %v2103_v6, %v3185_v49  ;;  %v2610_v56 = vadd.s32 %v2103_v6, %v3187_v50  ;;  %v3189_v51 = vld [vmem:[#allocation10_spill] sm:$0xff]  ;;  %v3191_v52 = vld [vmem:[#allocation11_spill] sm:$0xff] }
  0xb9   : > { %3183 = vst [vmem:[#allocation53_spill] sm:$0xff] %v2598_v53  ;;  %3184 = vst [vmem:[#allocation54_spill] sm:$0xff] %v2602_v54  ;;  %v2614_v57 = vadd.s32 %v2103_v6, %v3189_v51  ;;  %v2618_v58 = vadd.s32 %v2103_v6, %v3191_v52  ;;  %v3193_v53 = vld [vmem:[#allocation12_spill] sm:$0xff]  ;;  %v3195_v54 = vld [vmem:[#allocation13_spill] sm:$0xff] }
  0xba   : > { %3186 = vst [vmem:[#allocation8_spill] sm:$0xff] %v2606_v55  ;;  %3188 = vst [vmem:[#allocation9_spill] sm:$0xff] %v2610_v56  ;;  %v2622_v59 = vadd.s32 %v2103_v6, %v3193_v53  ;;  %v2626_v49 = vadd.s32 %v2103_v6, %v3195_v54  ;;  %v3197_v55 = vld [vmem:[#allocation14_spill] sm:$0xff]  ;;  %v3199_v56 = vld [vmem:[#allocation15_spill] sm:$0xff] }
  0xbb   : > { %3190 = vst [vmem:[#allocation10_spill] sm:$0xff] %v2614_v57  ;;  %3192 = vst [vmem:[#allocation11_spill] sm:$0xff] %v2618_v58  ;;  %v2630_v50 = vadd.s32 %v2103_v6, %v3197_v55  ;;  %v2634_v51 = vadd.s32 %v2103_v6, %v3199_v56  ;;  %v3201_v57 = vld [vmem:[#allocation16_spill] sm:$0xff]  ;;  %v3203_v58 = vld [vmem:[#allocation17_spill] sm:$0xff] }
  0xbc   : > { %3194 = vst [vmem:[#allocation12_spill] sm:$0xff] %v2622_v59  ;;  %3196 = vst [vmem:[#allocation13_spill] sm:$0xff] %v2626_v49  ;;  %v2638_v52 = vadd.s32 %v2103_v6, %v3201_v57  ;;  %v2642_v53 = vadd.s32 %v2103_v6, %v3203_v58  ;;  %v3205_v59 = vld [vmem:[#allocation18_spill] sm:$0xff]  ;;  %v3207_v49 = vld [vmem:[#allocation19_spill] sm:$0xff] }
  0xbd   : > { %3198 = vst [vmem:[#allocation14_spill] sm:$0xff] %v2630_v50  ;;  %3200 = vst [vmem:[#allocation15_spill] sm:$0xff] %v2634_v51  ;;  %v2646_v54 = vadd.s32 %v2103_v6, %v3205_v59  ;;  %v2650_v55 = vadd.s32 %v2103_v6, %v3207_v49  ;;  %v3209_v50 = vld [vmem:[#allocation20_spill] sm:$0xff]  ;;  %v3211_v51 = vld [vmem:[#allocation21_spill] sm:$0xff] }
  0xbe   : > { %3202 = vst [vmem:[#allocation16_spill] sm:$0xff] %v2638_v52  ;;  %3204 = vst [vmem:[#allocation17_spill] sm:$0xff] %v2642_v53  ;;  %v2654_v56 = vadd.s32 %v2103_v6, %v3209_v50  ;;  %v2658_v57 = vadd.s32 %v2103_v6, %v3211_v51  ;;  %v3213_v52 = vld [vmem:[#allocation22_spill] sm:$0xff]  ;;  %v3215_v53 = vld [vmem:[#allocation23_spill] sm:$0xff]  ;;  %v2678_v51 = vadd.s32 %v2103_v6, %v2323_v1 }
  0xbf   : > { %3206 = vst [vmem:[#allocation18_spill] sm:$0xff] %v2646_v54  ;;  %3208 = vst [vmem:[#allocation19_spill] sm:$0xff] %v2650_v55  ;;  %v2662_v58 = vadd.s32 %v2103_v6, %v3213_v52  ;;  %v2666_v59 = vadd.s32 %v2103_v6, %v3215_v53  ;;  %v3217_v54 = vld [vmem:[#allocation24_spill] sm:$0xff]  ;;  %v3219_v55 = vld [vmem:[#allocation25_spill] sm:$0xff] }
  0xc0   : > { %3210 = vst [vmem:[#allocation20_spill] sm:$0xff] %v2654_v56  ;;  %3212 = vst [vmem:[#allocation21_spill] sm:$0xff] %v2658_v57  ;;  %v2670_v49 = vadd.s32 %v2103_v6, %v3217_v54  ;;  %v2674_v50 = vadd.s32 %v2103_v6, %v3219_v55  ;;  %v3222_v57 = vld [vmem:[#allocation27_spill] sm:$0xff]  ;;  %v2690_v54 = vadd.s32 %v2103_v6, %v2336_v62 }
  0xc1   : > { %3214 = vst [vmem:[#allocation22_spill] sm:$0xff] %v2662_v58  ;;  %3216 = vst [vmem:[#allocation23_spill] sm:$0xff] %v2666_v59  ;;  %v2682_v52 = vadd.s32 %v2103_v6, %v3222_v57  ;;  %v3224_v58 = vld [vmem:[#allocation28_spill] sm:$0xff]  ;;  %v2702_v57 = vadd.s32 %v2103_v6, %v2349_v2  ;;  %v504_v59 = vld [vmem:[%s2086_s5 + $0x18] sm:$0xff] }
  0xc2   : > { %3218 = vst [vmem:[#allocation24_spill] sm:$0xff] %v2670_v49  ;;  %3220 = vst [vmem:[#allocation25_spill] sm:$0xff] %v2674_v50  ;;  %v2686_v53 = vadd.s32 %v2103_v6, %v3224_v58  ;;  %v3227_v49 = vld [vmem:[#allocation30_spill] sm:$0xff]  ;;  %v3229_v50 = vld [vmem:[#allocation31_spill] sm:$0xff] }
  0xc3   : > { %3221 = vst [vmem:[#allocation55_spill] sm:$0xff] %v2678_v51  ;;  %3223 = vst [vmem:[#allocation27_spill] sm:$0xff] %v2682_v52  ;;  %v2694_v55 = vadd.s32 %v2103_v6, %v3227_v49  ;;  %v2698_v1 = vadd.s32 %v2103_v6, %v3229_v50  ;;  %v3232_v52 = vld [vmem:[#allocation33_spill] sm:$0xff]  ;;  %v2714_v49 = vadd.s32 %v2103_v6, %v2362_v63 }
  0xc4   : > { %3225 = vst [vmem:[#allocation28_spill] sm:$0xff] %v2686_v53  ;;  %3226 = vst [vmem:[#allocation56_spill] sm:$0xff] %v2690_v54  ;;  %v2706_v58 = vadd.s32 %v2103_v6, %v3232_v52  ;;  %v3234_v53 = vld [vmem:[#allocation34_spill] sm:$0xff] }
  0xc5   : > { %3228 = vst [vmem:[#allocation30_spill] sm:$0xff] %v2694_v55  ;;  %3230 = vst [vmem:[#allocation31_spill] sm:$0xff] %v2698_v1  ;;  %v2710_v62 = vadd.s32 %v2103_v6, %v3234_v53  ;;  %v3237_v55 = vld [vmem:[#allocation36_spill] sm:$0xff]  ;;  %v3239_v1 = vld [vmem:[#allocation37_spill] sm:$0xff] }
  0xc6   : > { %3231 = vst [vmem:[#allocation57_spill] sm:$0xff] %v2702_v57  ;;  %3233 = vst [vmem:[#allocation33_spill] sm:$0xff] %v2706_v58  ;;  %v2718_v50 = vadd.s32 %v2103_v6, %v3237_v55  ;;  %v2722_v2 = vadd.s32 %v2103_v6, %v3239_v1  ;;  %v3241_v57 = vld [vmem:[#allocation38_spill] sm:$0xff]  ;;  %v3243_v58 = vld [vmem:[#allocation39_spill] sm:$0xff] }
  0xc7   : > { %3235 = vst [vmem:[#allocation34_spill] sm:$0xff] %v2710_v62  ;;  %3236 = vst [vmem:[#allocation58_spill] sm:$0xff] %v2714_v49  ;;  %v2726_v52 = vadd.s32 %v2103_v6, %v3241_v57  ;;  %v2730_v53 = vadd.s32 %v2103_v6, %v3243_v58  ;;  %v3245_v62 = vld [vmem:[#allocation40_spill] sm:$0xff]  ;;  %v3247_v49 = vld [vmem:[#allocation41_spill] sm:$0xff]  ;;  %v2746_v57 = vadd.s32 %v2103_v6, %v2386_v4 }
  0xc8   : > { %3238 = vst [vmem:[#allocation36_spill] sm:$0xff] %v2718_v50  ;;  %3240 = vst [vmem:[#allocation37_spill] sm:$0xff] %v2722_v2  ;;  %v2734_v63 = vadd.s32 %v2103_v6, %v3245_v62  ;;  %v2738_v55 = vadd.s32 %v2103_v6, %v3247_v49  ;;  %v3249_v1 = vld [vmem:[#allocation42_spill] sm:$0xff]  ;;  %v3252_v58 = vld [vmem:[#allocation43_spill] sm:$0xff]  ;;  %v2758_v49 = vadd.s32 %v2103_v6, %v2395_v60 }
  0xc9   : > { %3242 = vst [vmem:[#allocation38_spill] sm:$0xff] %v2726_v52  ;;  %3244 = vst [vmem:[#allocation39_spill] sm:$0xff] %v2730_v53  ;;  %v2742_v2 = vadd.s32 %v2103_v6, %v3249_v1  ;;  %v2750_v53 = vadd.s32 %v2103_v6, %v3252_v58  ;;  %v3254_v52 = vld [vmem:[#allocation44_spill] sm:$0xff]  ;;  %v2762_v1 = vadd.s32 %v2103_v6, %v2398_v5 }
  0xca   : > { %3246 = vst [vmem:[#allocation40_spill] sm:$0xff] %v2734_v63  ;;  %3248 = vst [vmem:[#allocation41_spill] sm:$0xff] %v2738_v55  ;;  %v2754_v62 = vadd.s32 %v2103_v6, %v3254_v52  ;;  %v502_v55 = vld [vmem:[%s2086_s5 + $0x8] sm:$0xff]  ;;  %v503_v63 = vld [vmem:[%s2086_s5 + $0x10] sm:$0xff] }
  0xcb   : > { %3250 = vst [vmem:[#allocation42_spill] sm:$0xff] %v2742_v2  ;;  %3251 = vst [vmem:[#allocation59_spill] sm:$0xff] %v2746_v57  ;;  %v3258_v2 = vld [vmem:[#allocation7_spill] sm:$0xff] }
  0xcc   : > { %3253 = vst [vmem:[#allocation43_spill] sm:$0xff] %v2750_v53  ;;  %3255 = vst [vmem:[#allocation44_spill] sm:$0xff] %v2754_v62  ;;  %v632_v4 = vadd.s32 8, %v3258_v2  ;;  %v633_v57 = vadd.s32 16, %v3258_v2  ;;  %v634_v58 = vadd.s32 24, %v3258_v2  ;;  %v760_v53 = vadd.s32 %v2103_v6, %v3258_v2 }
  0xcd   : > { %3256 = vst [vmem:[#allocation60_spill] sm:$0xff] %v2758_v49  ;;  %3257 = vst [vmem:[#allocation61_spill] sm:$0xff] %v2762_v1  ;;  %v635_v62 = vadd.s32 32, %v3258_v2  ;;  %v501_v49 = vld [vmem:[%s2086_s5] sm:$0xff]  ;;  %v636_v5 = vadd.s32 40, %v3258_v2  ;;  %v637_v50 = vadd.s32 48, %v3258_v2 }
  0xce   : > { %v761_v52 = vadd.s32 %v2103_v6, %v632_v4  ;;  %v762_v60 = vadd.s32 %v2103_v6, %v633_v57  ;;  %v763_v1 = vadd.s32 %v2103_v6, %v634_v58  ;;  %vm888_vm0 = vcmp.lt.s32.totalorder %v760_v53, 1500  ;;  %v505_v58 = vld [vmem:[%s2086_s5 + $0x20] sm:$0xff] }
  0xcf   : > { %v764_v54 = vadd.s32 %v2103_v6, %v635_v62  ;;  %v1016_v4 = vsel %vm888_vm0, %v501_v49, 0.0  ;;  %v638_v57 = vadd.s32 56, %v3258_v2  ;;  %v765_v56 = vadd.s32 %v2103_v6, %v636_v5 }
  0xd0   : > { %vm889_vm1 = vcmp.lt.s32.totalorder %v761_v52, 1500  ;;  %vm890_vm2 = vcmp.lt.s32.totalorder %v762_v60, 1500  ;;  %vm891_vm3 = vcmp.lt.s32.totalorder %v763_v1, 1500  ;;  %v639_v53 = vadd.s32 64, %v3258_v2  ;;  %v506_v60 = vld [vmem:[%s2086_s5 + $0x28] sm:$0xff]  ;;  %v507_v1 = vld [vmem:[%s2086_s5 + $0x30] sm:$0xff] }
  0xd1   : > { %v1017_v51 = vsel %vm889_vm1, %v502_v55, 0.0  ;;  %v1018_v48 = vsel %vm890_vm2, %v503_v63, 0.0  ;;  %v766_v52 = vadd.s32 %v2103_v6, %v637_v50  ;;  %vm892_vm4 = vcmp.lt.s32.totalorder %v764_v54, 1500 }
  0xd2   : > { %v1145_v47 = vadd.f32 %v1017_v51, %v1016_v4  ;;  %v1019_v62 = vsel %vm891_vm3, %v504_v59, 0.0  ;;  %v640_v55 = vadd.s32 72, %v3258_v2  ;;  %v767_v49 = vadd.s32 %v2103_v6, %v638_v57  ;;  %v508_v51 = vld [vmem:[%s2086_s5 + $0x38] sm:$0xff] }
  0xd3   : > { %vm893_vm5 = vcmp.lt.s32.totalorder %v765_v56, 1500  ;;  %v1020_v5 = vsel %vm892_vm4, %v505_v58, 0.0  ;;  %v641_v63 = vadd.s32 80, %v3258_v2  ;;  %v768_v45 = vadd.s32 %v2103_v6, %v639_v53 }
  0xd4   : > { %v1146_v46 = vadd.f32 %v1145_v47, %v1018_v48  ;;  %vm894_vm6 = vcmp.lt.s32.totalorder %v766_v52, 1500  ;;  %v1021_v54 = vsel %vm893_vm5, %v506_v60, 0.0  ;;  %v642_v59 = vadd.s32 88, %v3258_v2  ;;  %v509_v47 = vld [vmem:[%s2086_s5 + $0x40] sm:$0xff] }
  0xd5   : > { %v769_v4 = vadd.s32 %v2103_v6, %v640_v55  ;;  %vm895_vm7 = vcmp.lt.s32.totalorder %v767_v49, 1500  ;;  %v1022_v56 = vsel %vm894_vm6, %v507_v1, 0.0  ;;  %v643_v48 = vadd.s32 96, %v3258_v2 }
  0xd6   : > { %v1147_v50 = vadd.f32 %v1146_v46, %v1019_v62  ;;  %v770_v58 = vadd.s32 %v2103_v6, %v641_v63  ;;  %vm896_vm8 = vcmp.lt.s32.totalorder %v768_v45, 1500  ;;  %v1023_v52 = vsel %vm895_vm7, %v508_v51, 0.0  ;;  %v510_v46 = vld [vmem:[%s2086_s5 + $0x48] sm:$0xff] }
  0xd7   : > { %v644_v62 = vadd.s32 104, %v3258_v2  ;;  %v771_v60 = vadd.s32 %v2103_v6, %v642_v59  ;;  %vm897_vm9 = vcmp.lt.s32.totalorder %v769_v4, 1500  ;;  %v1024_v49 = vsel %vm896_vm8, %v509_v47, 0.0 }
  0xd8   : > { %v1148_v57 = vadd.f32 %v1147_v50, %v1020_v5  ;;  %v511_v5 = vld [vmem:[%s2086_s5 + $0x50] sm:$0xff]  ;;  %v645_v1 = vadd.s32 112, %v3258_v2  ;;  %v772_v50 = vadd.s32 %v2103_v6, %v643_v48  ;;  %vm898_vm10 = vcmp.lt.s32.totalorder %v770_v58, 1500 }
  0xd9   : > { %v1025_v45 = vsel %vm897_vm9, %v510_v46, 0.0  ;;  %v646_v51 = vadd.s32 120, %v3258_v2  ;;  %vm899_vm11 = vcmp.lt.s32.totalorder %v771_v60, 1500  ;;  %v1026_v4 = vsel %vm898_vm10, %v511_v5, 0.0 }
  0xda   : > { %v1149_v53 = vadd.f32 %v1148_v57, %v1021_v54  ;;  %v512_v54 = vld [vmem:[%s2086_s5 + $0x58] sm:$0xff]  ;;  %v773_v57 = vadd.s32 %v2103_v6, %v644_v62  ;;  %v647_v47 = vadd.s32 128, %v3258_v2  ;;  %vm900_vm12 = vcmp.lt.s32.totalorder %v772_v50, 1500 }
  0xdb   : > { %v1027_v58 = vsel %vm899_vm11, %v512_v54, 0.0  ;;  %v648_v46 = vadd.s32 136, %v3258_v2  ;;  %v649_v5 = vadd.s32 144, %v3258_v2  ;;  %v650_v54 = vadd.s32 152, %v3258_v2 }
  0xdc   : > { %v1150_v55 = vadd.f32 %v1149_v53, %v1022_v56  ;;  %v513_v56 = vld [vmem:[%s2086_s5 + $0x60] sm:$0xff]  ;;  %v774_v53 = vadd.s32 %v2103_v6, %v645_v1  ;;  %vm901_vm13 = vcmp.lt.s32.totalorder %v773_v57, 1500 }
  0xdd   : > { %v1028_v60 = vsel %vm900_vm12, %v513_v56, 0.0  ;;  %v651_v56 = vadd.s32 160, %v3258_v2 }
  0xde   : > { %v1151_v63 = vadd.f32 %v1150_v55, %v1023_v52  ;;  %v514_v52 = vld [vmem:[%s2086_s5 + $0x68] sm:$0xff]  ;;  %v775_v55 = vadd.s32 %v2103_v6, %v646_v51  ;;  %vm902_vm14 = vcmp.lt.s32.totalorder %v774_v53, 1500 }
  0xdf   : > { %v1029_v50 = vsel %vm901_vm13, %v514_v52, 0.0  ;;  %v652_v52 = vadd.s32 168, %v3258_v2 }
  0xe0   : > { %v1152_v59 = vadd.f32 %v1151_v63, %v1024_v49  ;;  %v515_v49 = vld [vmem:[%s2086_s5 + $0x70] sm:$0xff]  ;;  %v776_v63 = vadd.s32 %v2103_v6, %v647_v47  ;;  %vm903_vm15 = vcmp.lt.s32.totalorder %v775_v55, 1500 }
  0xe1   : > { %v1030_v57 = vsel %vm902_vm14, %v515_v49, 0.0  ;;  %v653_v49 = vadd.s32 176, %v3258_v2 }
  0xe2   : > { %v1153_v48 = vadd.f32 %v1152_v59, %v1025_v45  ;;  %v516_v45 = vld [vmem:[%s2086_s5 + $0x78] sm:$0xff]  ;;  %v777_v59 = vadd.s32 %v2103_v6, %v648_v46  ;;  %vm904_vm0 = vcmp.lt.s32.totalorder %v776_v63, 1500 }
  0xe3   : > { %v1031_v53 = vsel %vm903_vm15, %v516_v45, 0.0  ;;  %v654_v45 = vadd.s32 184, %v3258_v2 }
  0xe4   : > { %v1154_v62 = vadd.f32 %v1153_v48, %v1026_v4  ;;  %v517_v4 = vld [vmem:[%s2086_s5 + $0x80] sm:$0xff]  ;;  %v778_v48 = vadd.s32 %v2103_v6, %v649_v5  ;;  %vm905_vm1 = vcmp.lt.s32.totalorder %v777_v59, 1500 }
  0xe5   : > { %v1032_v55 = vsel %vm904_vm0, %v517_v4, 0.0  ;;  %v655_v4 = vadd.s32 192, %v3258_v2 }
  0xe6   : > { %v1155_v1 = vadd.f32 %v1154_v62, %v1027_v58  ;;  %v518_v58 = vld [vmem:[%s2086_s5 + $0x88] sm:$0xff]  ;;  %v779_v62 = vadd.s32 %v2103_v6, %v650_v54  ;;  %vm906_vm2 = vcmp.lt.s32.totalorder %v778_v48, 1500 }
  0xe7   : > { %v1033_v63 = vsel %vm905_vm1, %v518_v58, 0.0  ;;  %v656_v58 = vadd.s32 200, %v3258_v2 }
  0xe8   : > { %v1156_v51 = vadd.f32 %v1155_v1, %v1028_v60  ;;  %v519_v60 = vld [vmem:[%s2086_s5 + $0x90] sm:$0xff]  ;;  %v780_v1 = vadd.s32 %v2103_v6, %v651_v56  ;;  %vm907_vm3 = vcmp.lt.s32.totalorder %v779_v62, 1500 }
  0xe9   : > { %v1034_v59 = vsel %vm906_vm2, %v519_v60, 0.0  ;;  %v657_v60 = vadd.s32 208, %v3258_v2 }
  0xea   : > { %v1157_v47 = vadd.f32 %v1156_v51, %v1029_v50  ;;  %v520_v50 = vld [vmem:[%s2086_s5 + $0x98] sm:$0xff]  ;;  %v781_v51 = vadd.s32 %v2103_v6, %v652_v52  ;;  %vm908_vm4 = vcmp.lt.s32.totalorder %v780_v1, 1500 }
  0xeb   : > { %v1035_v48 = vsel %vm907_vm3, %v520_v50, 0.0  ;;  %v658_v50 = vadd.s32 216, %v3258_v2 }
  0xec   : > { %v1158_v46 = vadd.f32 %v1157_v47, %v1030_v57  ;;  %v521_v57 = vld [vmem:[%s2086_s5 + $0xa0] sm:$0xff]  ;;  %v782_v47 = vadd.s32 %v2103_v6, %v653_v49  ;;  %vm909_vm5 = vcmp.lt.s32.totalorder %v781_v51, 1500 }
  0xed   : > { %v1036_v62 = vsel %vm908_vm4, %v521_v57, 0.0  ;;  %v659_v57 = vadd.s32 224, %v3258_v2 }
  0xee   : > { %v1159_v5 = vadd.f32 %v1158_v46, %v1031_v53  ;;  %v522_v53 = vld [vmem:[%s2086_s5 + $0xa8] sm:$0xff]  ;;  %v783_v46 = vadd.s32 %v2103_v6, %v654_v45  ;;  %vm910_vm6 = vcmp.lt.s32.totalorder %v782_v47, 1500 }
  0xef   : > { %v1037_v1 = vsel %vm909_vm5, %v522_v53, 0.0  ;;  %v660_v53 = vadd.s32 232, %v3258_v2  ;;  %vm925_vm5 = vcmp.lt.s32.totalorder %v2402_v8, 1500 }
  0xf0   : > { %v1160_v54 = vadd.f32 %v1159_v5, %v1032_v55  ;;  %v523_v55 = vld [vmem:[%s2086_s5 + $0xb0] sm:$0xff]  ;;  %v784_v5 = vadd.s32 %v2103_v6, %v655_v4  ;;  %vm911_vm7 = vcmp.lt.s32.totalorder %v783_v46, 1500 }
  0xf1   : > { %v1038_v51 = vsel %vm910_vm6, %v523_v55, 0.0  ;;  %v661_v55 = vadd.s32 240, %v3258_v2  ;;  %vm926_vm6 = vcmp.lt.s32.totalorder %v2406_v61, 1500 }
  0xf2   : > { %v1161_v56 = vadd.f32 %v1160_v54, %v1033_v63  ;;  %v524_v63 = vld [vmem:[%s2086_s5 + $0xb8] sm:$0xff]  ;;  %v785_v54 = vadd.s32 %v2103_v6, %v656_v58  ;;  %vm912_vm8 = vcmp.lt.s32.totalorder %v784_v5, 1500 }
  0xf3   : > { %v1039_v47 = vsel %vm911_vm7, %v524_v63, 0.0  ;;  %v662_v63 = vadd.s32 248, %v3258_v2  ;;  %vm927_vm7 = vcmp.lt.s32.totalorder %v2410_v7, 1500 }
  0xf4   : > { %v1162_v52 = vadd.f32 %v1161_v56, %v1034_v59  ;;  %v525_v59 = vld [vmem:[%s2086_s5 + $0xc0] sm:$0xff]  ;;  %v786_v56 = vadd.s32 %v2103_v6, %v657_v60  ;;  %vm913_vm9 = vcmp.lt.s32.totalorder %v785_v54, 1500 }
  0xf5   : > { %v1040_v46 = vsel %vm912_vm8, %v525_v59, 0.0  ;;  %v663_v59 = vadd.s32 256, %v3258_v2  ;;  %vm928_vm8 = vcmp.lt.s32.totalorder %v2414_v0, 1500 }
  0xf6   : > { %v1163_v49 = vadd.f32 %v1162_v52, %v1035_v48  ;;  %v526_v48 = vld [vmem:[%s2086_s5 + $0xc8] sm:$0xff]  ;;  %v787_v52 = vadd.s32 %v2103_v6, %v658_v50  ;;  %vm914_vm10 = vcmp.lt.s32.totalorder %v786_v56, 1500 }
  0xf7   : > { %v1041_v5 = vsel %vm913_vm9, %v526_v48, 0.0  ;;  %v791_v48 = vadd.s32 %v2103_v6, %v662_v63  ;;  %vm929_vm9 = vcmp.lt.s32.totalorder %v2418_v3, 1500 }
  0xf8   : > { %v1164_v45 = vadd.f32 %v1163_v49, %v1036_v62  ;;  %v527_v62 = vld [vmem:[%s2086_s5 + $0xd0] sm:$0xff]  ;;  %v788_v49 = vadd.s32 %v2103_v6, %v659_v57  ;;  %vm915_vm11 = vcmp.lt.s32.totalorder %v787_v52, 1500 }
  0xf9   : > { %v1042_v54 = vsel %vm914_vm10, %v527_v62, 0.0  ;;  %v531_v52 = vld [vmem:[%s2086_s5 + $0xf0] sm:$0xff]  ;;  %vm919_vm15 = vcmp.lt.s32.totalorder %v791_v48, 1500  ;;  %vm930_vm10 = vcmp.lt.s32.totalorder %v2422_v9, 1500 }
  0xfa   : > { %v1165_v4 = vadd.f32 %v1164_v45, %v1037_v1  ;;  %v528_v1 = vld [vmem:[%s2086_s5 + $0xd8] sm:$0xff]  ;;  %v789_v45 = vadd.s32 %v2103_v6, %v660_v53  ;;  %vm916_vm12 = vcmp.lt.s32.totalorder %v788_v49, 1500 }
  0xfb   : > { %v1043_v56 = vsel %vm915_vm11, %v528_v1, 0.0  ;;  %vm931_vm11 = vcmp.lt.s32.totalorder %v2426_v10, 1500 }
  0xfc   : > { %v1166_v58 = vadd.f32 %v1165_v4, %v1038_v51  ;;  %v529_v51 = vld [vmem:[%s2086_s5 + $0xe0] sm:$0xff]  ;;  %v790_v4 = vadd.s32 %v2103_v6, %v661_v55  ;;  %vm917_vm13 = vcmp.lt.s32.totalorder %v789_v45, 1500  ;;  %v534_v45 = vld [vmem:[%s2086_s5 + $0x108] sm:$0xff] }
  0xfd   : > { %v1044_v53 = vsel %vm916_vm12, %v529_v51, 0.0  ;;  %v535_v51 = vld [vmem:[%s2086_s5 + $0x110] sm:$0xff]  ;;  %vm932_vm12 = vcmp.lt.s32.totalorder %v2430_v11, 1500 }
  0xfe   : > { %v1167_v60 = vadd.f32 %v1166_v58, %v1039_v47  ;;  %v530_v47 = vld [vmem:[%s2086_s5 + $0xe8] sm:$0xff]  ;;  %vm918_vm14 = vcmp.lt.s32.totalorder %v790_v4, 1500 }
  0xff   : > { %v1045_v2 = vsel %vm917_vm13, %v530_v47, 0.0  ;;  %v1046_v49 = vsel %vm918_vm14, %v531_v52, 0.0  ;;  %v3261_v47 = vld [vmem:[#allocation32_spill] sm:$0xff]  ;;  %v3262_v52 = vld [vmem:[#allocation35_spill] sm:$0xff]  ;;  %vm933_vm13 = vcmp.lt.s32.totalorder %v2434_v12, 1500  ;;  %vm934_vm14 = vcmp.lt.s32.totalorder %v2438_v13, 1500 }
 0x100   : > { %v1168_v50 = vadd.f32 %v1167_v60, %v1040_v46  ;;  %v792_v46 = vadd.s32 %v2103_v6, %v663_v59  ;;  %v532_v60 = vld [vmem:[%s2086_s5 + $0xf8] sm:$0xff]  ;;  %vm923_vm3 = vcmp.lt.s32.totalorder %v3261_v47, 1500  ;;  %vm924_vm4 = vcmp.lt.s32.totalorder %v3262_v52, 1500 }
 0x101   : > { %v1047_v63 = vsel %vm919_vm15, %v532_v60, 0.0  ;;  %v3260_v59 = vld [vmem:[#allocation29_spill] sm:$0xff]  ;;  %vm935_vm15 = vcmp.lt.s32.totalorder %v2442_v14, 1500 }
 0x102   : > { %v1169_v57 = vadd.f32 %v1168_v50, %v1041_v5  ;;  %v533_v5 = vld [vmem:[%s2086_s5 + $0x100] sm:$0xff]  ;;  %vm920_vm0 = vcmp.lt.s32.totalorder %v792_v46, 1500  ;;  %vm922_vm2 = vcmp.lt.s32.totalorder %v3260_v59, 1500 }
 0x103   : > { %v3259_v50 = vld [vmem:[#allocation26_spill] sm:$0xff]  ;;  %v1048_v6 = vsel %vm920_vm0, %v533_v5, 0.0  ;;  %vm936_vm0 = vcmp.lt.s32.totalorder %v2446_v15, 1500 }
 0x104   : > { %v1170_v58 = vadd.f32 %v1169_v57, %v1042_v54  ;;  %vm921_vm1 = vcmp.lt.s32.totalorder %v3259_v50, 1500 }
 0x105   : > { %v1049_v57 = vsel %vm921_vm1, %v534_v45, 0.0  ;;  %vm937_vm1 = vcmp.lt.s32.totalorder %v2450_v16, 1500 }
 0x106   : > { %v1171_v62 = vadd.f32 %v1170_v58, %v1043_v56  ;;  %v536_v56 = vld [vmem:[%s2086_s5 + $0x118] sm:$0xff]  ;;  %v1050_v58 = vsel %vm922_vm2, %v535_v51, 0.0  ;;  %v542_v51 = vld [vmem:[%s2086_s5 + $0x148] sm:$0xff]  ;;  %vm938_vm2 = vcmp.lt.s32.totalorder %v2454_v17, 1500 }
 0x107   : > { %v1057_v7 = vsel %vm929_vm9, %v542_v51, 0.0  ;;  %v554_v51 = vld [vmem:[%s2086_s5 + $0x1a8] sm:$0xff]  ;;  %vm945_vm9 = vcmp.lt.s32.totalorder %v2482_v24, 1500 }
 0x108   : > { %v1172_v55 = vadd.f32 %v1171_v62, %v1044_v53  ;;  %v537_v53 = vld [vmem:[%s2086_s5 + $0x120] sm:$0xff]  ;;  %v1051_v62 = vsel %vm923_vm3, %v536_v56, 0.0  ;;  %v544_v56 = vld [vmem:[%s2086_s5 + $0x158] sm:$0xff]  ;;  %vm939_vm3 = vcmp.lt.s32.totalorder %v2458_v18, 1500 }
 0x109   : > { %v1059_v3 = vsel %vm931_vm11, %v544_v56, 0.0  ;;  %v557_v56 = vld [vmem:[%s2086_s5 + $0x1c0] sm:$0xff]  ;;  %vm947_vm11 = vcmp.lt.s32.totalorder %v2490_v26, 1500 }
 0x10a   : > { %v1173_v1 = vadd.f32 %v1172_v55, %v1045_v2  ;;  %v538_v2 = vld [vmem:[%s2086_s5 + $0x128] sm:$0xff]  ;;  %v1052_v55 = vsel %vm924_vm4, %v537_v53, 0.0  ;;  %vm940_vm4 = vcmp.lt.s32.totalorder %v2462_v19, 1500 }
 0x10b   : > { %v546_v53 = vld [vmem:[%s2086_s5 + $0x168] sm:$0xff] }
 0x10c   : > { %v1174_v54 = vadd.f32 %v1173_v1, %v1046_v49  ;;  %v539_v49 = vld [vmem:[%s2086_s5 + $0x130] sm:$0xff]  ;;  %v1053_v1 = vsel %vm925_vm5, %v538_v2, 0.0  ;;  %v1061_v10 = vsel %vm933_vm13, %v546_v53, 0.0  ;;  %v548_v2 = vld [vmem:[%s2086_s5 + $0x178] sm:$0xff]  ;;  %vm941_vm5 = vcmp.lt.s32.totalorder %v2466_v20, 1500 }
 0x10d   : > { %v1054_v50 = vsel %vm926_vm6, %v539_v49, 0.0  ;;  %v1063_v12 = vsel %vm935_vm15, %v548_v2, 0.0  ;;  %vm942_vm6 = vcmp.lt.s32.totalorder %v2470_v21, 1500  ;;  %v1069_v18 = vsel %vm941_vm5, %v554_v51, 0.0  ;;  %v560_v53 = vld [vmem:[%s2086_s5 + $0x1d8] sm:$0xff]  ;;  %v563_v2 = vld [vmem:[%s2086_s5 + $0x1f0] sm:$0xff] }
 0x10e   : > { %v1175_v4 = vadd.f32 %v1174_v54, %v1047_v63  ;;  %v540_v63 = vld [vmem:[%s2086_s5 + $0x138] sm:$0xff]  ;;  %v541_v54 = vld [vmem:[%s2086_s5 + $0x140] sm:$0xff]  ;;  %v1075_v24 = vsel %vm947_vm11, %v560_v53, 0.0  ;;  %vm949_vm13 = vcmp.lt.s32.totalorder %v2498_v28, 1500  ;;  %vm951_vm15 = vcmp.lt.s32.totalorder %v2506_v30, 1500 }
 0x10f   : > { %v1055_v8 = vsel %vm927_vm7, %v540_v63, 0.0  ;;  %v1056_v61 = vsel %vm928_vm8, %v541_v54, 0.0  ;;  %v551_v63 = vld [vmem:[%s2086_s5 + $0x190] sm:$0xff]  ;;  %vm943_vm7 = vcmp.lt.s32.totalorder %v2474_v22, 1500  ;;  %vm944_vm8 = vcmp.lt.s32.totalorder %v2478_v23, 1500  ;;  %v572_v51 = vld [vmem:[%s2086_s5 + $0x238] sm:$0xff] }
 0x110   : > { %v1176_v48 = vadd.f32 %v1175_v4, %v1048_v6  ;;  %v543_v4 = vld [vmem:[%s2086_s5 + $0x150] sm:$0xff]  ;;  %v1066_v15 = vsel %vm938_vm2, %v551_v63, 0.0  ;;  %v1072_v21 = vsel %vm944_vm8, %v557_v56, 0.0  ;;  %vm954_vm2 = vcmp.lt.s32.totalorder %v2518_v33, 1500  ;;  %v3264_v53 = vld [vmem:[#allocation46_spill] sm:$0xff] }
 0x111   : > { %v1058_v0 = vsel %vm930_vm10, %v543_v4, 0.0  ;;  %vm946_vm10 = vcmp.lt.s32.totalorder %v2486_v25, 1500  ;;  %vm957_vm5 = vcmp.lt.s32.totalorder %v2530_v36, 1500  ;;  %vm960_vm8 = vcmp.lt.s32.totalorder %v2542_v39, 1500 }
 0x112   : > { %v1177_v46 = vadd.f32 %v1176_v48, %v1049_v57  ;;  %v545_v48 = vld [vmem:[%s2086_s5 + $0x160] sm:$0xff]  ;;  %vm963_vm11 = vcmp.lt.s32.totalorder %v2554_v42, 1500 }
 0x113   : > { %v1060_v9 = vsel %vm932_vm12, %v545_v48, 0.0  ;;  %vm948_vm12 = vcmp.lt.s32.totalorder %v2494_v27, 1500 }
 0x114   : > { %v1178_v60 = vadd.f32 %v1177_v46, %v1050_v58  ;;  %v547_v46 = vld [vmem:[%s2086_s5 + $0x170] sm:$0xff] }
 0x115   : > { %v1062_v11 = vsel %vm934_vm14, %v547_v46, 0.0  ;;  %vm950_vm14 = vcmp.lt.s32.totalorder %v2502_v29, 1500 }
 0x116   : > { %v1179_v5 = vadd.f32 %v1178_v60, %v1051_v62  ;;  %v1078_v27 = vsel %vm950_vm14, %v563_v2, 0.0  ;;  %v583_v2 = vld [vmem:[%s2086_s5 + $0x290] sm:$0xff] }
 0x118   : > { %v1180_v45 = vadd.f32 %v1179_v5, %v1052_v55  ;;  %v549_v55 = vld [vmem:[%s2086_s5 + $0x180] sm:$0xff]  ;;  %v550_v5 = vld [vmem:[%s2086_s5 + $0x188] sm:$0xff] }
 0x119   : > { %v1064_v13 = vsel %vm936_vm0, %v549_v55, 0.0  ;;  %v1065_v14 = vsel %vm937_vm1, %v550_v5, 0.0  ;;  %vm952_vm0 = vcmp.lt.s32.totalorder %v2510_v31, 1500  ;;  %v566_v5 = vld [vmem:[%s2086_s5 + $0x208] sm:$0xff]  ;;  %vm953_vm1 = vcmp.lt.s32.totalorder %v2514_v32, 1500 }
 0x11a   : > { %v1181_v6 = vadd.f32 %v1180_v45, %v1053_v1  ;;  %v1081_v30 = vsel %vm953_vm1, %v566_v5, 0.0  ;;  %v3269_v5 = vld [vmem:[#allocation51_spill] sm:$0xff] }
 0x11c   : > { %v1182_v59 = vadd.f32 %v1181_v6, %v1054_v50  ;;  %v552_v50 = vld [vmem:[%s2086_s5 + $0x198] sm:$0xff]  ;;  %v553_v6 = vld [vmem:[%s2086_s5 + $0x1a0] sm:$0xff] }
 0x11d   : > { %v1067_v16 = vsel %vm939_vm3, %v552_v50, 0.0  ;;  %v1068_v17 = vsel %vm940_vm4, %v553_v6, 0.0  ;;  %vm955_vm3 = vcmp.lt.s32.totalorder %v2522_v34, 1500  ;;  %v569_v50 = vld [vmem:[%s2086_s5 + $0x220] sm:$0xff]  ;;  %vm956_vm4 = vcmp.lt.s32.totalorder %v2526_v35, 1500 }
 0x11e   : > { %v1183_v57 = vadd.f32 %v1182_v59, %v1055_v8  ;;  %v1084_v33 = vsel %vm956_vm4, %v569_v50, 0.0  ;;  %vm972_vm4 = vcmp.lt.s32.totalorder %v3269_v5, 1500  ;;  %v3285_v5 = vld [vmem:[#allocation20_spill] sm:$0xff] }
 0x120   : > { %v1184_v47 = vadd.f32 %v1183_v57, %v1056_v61  ;;  %v555_v61 = vld [vmem:[%s2086_s5 + $0x1b0] sm:$0xff]  ;;  %v556_v57 = vld [vmem:[%s2086_s5 + $0x1b8] sm:$0xff] }
 0x121   : > { %v1070_v19 = vsel %vm942_vm6, %v555_v61, 0.0  ;;  %v1071_v20 = vsel %vm943_vm7, %v556_v57, 0.0  ;;  %vm958_vm6 = vcmp.lt.s32.totalorder %v2534_v37, 1500  ;;  %vm959_vm7 = vcmp.lt.s32.totalorder %v2538_v38, 1500  ;;  %v575_v57 = vld [vmem:[%s2086_s5 + $0x250] sm:$0xff] }
 0x122   : > { %v1185_v58 = vadd.f32 %v1184_v47, %v1057_v7  ;;  %v1087_v36 = vsel %vm959_vm7, %v572_v51, 0.0 }
 0x124   : > { %v1186_v52 = vadd.f32 %v1185_v58, %v1058_v0  ;;  %v558_v0 = vld [vmem:[%s2086_s5 + $0x1c8] sm:$0xff]  ;;  %v559_v58 = vld [vmem:[%s2086_s5 + $0x1d0] sm:$0xff] }
 0x125   : > { %v1073_v22 = vsel %vm945_vm9, %v558_v0, 0.0  ;;  %v1074_v23 = vsel %vm946_vm10, %v559_v58, 0.0  ;;  %vm961_vm9 = vcmp.lt.s32.totalorder %v2546_v40, 1500  ;;  %vm962_vm10 = vcmp.lt.s32.totalorder %v2550_v41, 1500  ;;  %v578_v0 = vld [vmem:[%s2086_s5 + $0x268] sm:$0xff]  ;;  %v3263_v58 = vld [vmem:[#allocation45_spill] sm:$0xff] }
 0x126   : > { %v1187_v62 = vadd.f32 %v1186_v52, %v1059_v3  ;;  %v1090_v39 = vsel %vm962_vm10, %v575_v57, 0.0  ;;  %vm966_vm14 = vcmp.lt.s32.totalorder %v3263_v58, 1500  ;;  %v592_v57 = vld [vmem:[%s2086_s5 + $0x2d8] sm:$0xff] }
 0x127   : > { %v3279_v58 = vld [vmem:[#allocation14_spill] sm:$0xff] }
 0x128   : > { %v1188_v60 = vadd.f32 %v1187_v62, %v1060_v9  ;;  %v561_v9 = vld [vmem:[%s2086_s5 + $0x1e0] sm:$0xff]  ;;  %v562_v62 = vld [vmem:[%s2086_s5 + $0x1e8] sm:$0xff] }
 0x129   : > { %v1076_v25 = vsel %vm948_vm12, %v561_v9, 0.0  ;;  %v1077_v26 = vsel %vm949_vm13, %v562_v62, 0.0  ;;  %vm964_vm12 = vcmp.lt.s32.totalorder %v2558_v43, 1500  ;;  %vm965_vm13 = vcmp.lt.s32.totalorder %v2562_v44, 1500  ;;  %v3265_v9 = vld [vmem:[#allocation47_spill] sm:$0xff]  ;;  %v3266_v62 = vld [vmem:[#allocation48_spill] sm:$0xff] }
 0x12a   : > { %v1189_v49 = vadd.f32 %v1188_v60, %v1061_v10  ;;  %v1093_v42 = vsel %vm965_vm13, %v578_v0, 0.0  ;;  %vm969_vm1 = vcmp.lt.s32.totalorder %v3266_v62, 1500  ;;  %v3278_v0 = vld [vmem:[#allocation13_spill] sm:$0xff] }
 0x12b   : > { %vm981_vm13 = vcmp.lt.s32.totalorder %v3278_v0, 1500  ;;  %v3282_v62 = vld [vmem:[#allocation17_spill] sm:$0xff]  ;;  %v3294_v0 = vld [vmem:[#allocation56_spill] sm:$0xff] }
 0x12c   : > { %v1190_v1 = vadd.f32 %v1189_v49, %v1062_v11  ;;  %v564_v11 = vld [vmem:[%s2086_s5 + $0x1f8] sm:$0xff]  ;;  %v565_v49 = vld [vmem:[%s2086_s5 + $0x200] sm:$0xff] }
 0x12d   : > { %v1079_v28 = vsel %vm951_vm15, %v564_v11, 0.0  ;;  %v1080_v29 = vsel %vm952_vm0, %v565_v49, 0.0  ;;  %vm967_vm15 = vcmp.lt.s32.totalorder %v3264_v53, 1500  ;;  %vm968_vm0 = vcmp.lt.s32.totalorder %v3265_v9, 1500  ;;  %v3280_v53 = vld [vmem:[#allocation15_spill] sm:$0xff]  ;;  %v3281_v9 = vld [vmem:[#allocation16_spill] sm:$0xff] }
 0x12e   : > { %v1191_v45 = vadd.f32 %v1190_v1, %v1063_v12 }
 0x130   : > { %v1192_v54 = vadd.f32 %v1191_v45, %v1064_v13  ;;  %v567_v13 = vld [vmem:[%s2086_s5 + $0x210] sm:$0xff]  ;;  %v568_v45 = vld [vmem:[%s2086_s5 + $0x218] sm:$0xff] }
 0x131   : > { %v1082_v31 = vsel %vm954_vm2, %v567_v13, 0.0  ;;  %v1083_v32 = vsel %vm955_vm3, %v568_v45, 0.0  ;;  %v586_v13 = vld [vmem:[%s2086_s5 + $0x2a8] sm:$0xff] }
 0x132   : > { %v1193_v8 = vadd.f32 %v1192_v54, %v1065_v14 }
 0x134   : > { %v1194_v59 = vadd.f32 %v1193_v8, %v1066_v15  ;;  %v570_v15 = vld [vmem:[%s2086_s5 + $0x228] sm:$0xff]  ;;  %v571_v8 = vld [vmem:[%s2086_s5 + $0x230] sm:$0xff] }
 0x135   : > { %v1085_v34 = vsel %vm957_vm5, %v570_v15, 0.0  ;;  %v1086_v35 = vsel %vm958_vm6, %v571_v8, 0.0  ;;  %v3272_v15 = vld [vmem:[#allocation54_spill] sm:$0xff] }
 0x136   : > { %v1195_v4 = vadd.f32 %v1194_v59, %v1067_v16  ;;  %vm975_vm7 = vcmp.lt.s32.totalorder %v3272_v15, 1500  ;;  %v589_v8 = vld [vmem:[%s2086_s5 + $0x2c0] sm:$0xff] }
 0x137   : > { %v3288_v15 = vld [vmem:[#allocation23_spill] sm:$0xff] }
 0x138   : > { %v1196_v7 = vadd.f32 %v1195_v4, %v1068_v17  ;;  %v573_v17 = vld [vmem:[%s2086_s5 + $0x240] sm:$0xff]  ;;  %v574_v4 = vld [vmem:[%s2086_s5 + $0x248] sm:$0xff] }
 0x139   : > { %v1088_v37 = vsel %vm960_vm8, %v573_v17, 0.0  ;;  %v1089_v38 = vsel %vm961_vm9, %v574_v4, 0.0  ;;  %v3275_v4 = vld [vmem:[#allocation10_spill] sm:$0xff] }
 0x13a   : > { %v1197_v47 = vadd.f32 %v1196_v7, %v1069_v18  ;;  %vm978_vm10 = vcmp.lt.s32.totalorder %v3275_v4, 1500  ;;  %v3291_v4 = vld [vmem:[#allocation55_spill] sm:$0xff] }
 0x13c   : > { %v1198_v48 = vadd.f32 %v1197_v47, %v1070_v19  ;;  %v576_v19 = vld [vmem:[%s2086_s5 + $0x258] sm:$0xff]  ;;  %v577_v47 = vld [vmem:[%s2086_s5 + $0x260] sm:$0xff] }
 0x13d   : > { %v1091_v40 = vsel %vm963_vm11, %v576_v19, 0.0  ;;  %v1092_v41 = vsel %vm964_vm12, %v577_v47, 0.0 }
 0x13e   : > { %v1199_v3 = vadd.f32 %v1198_v48, %v1071_v20 }
 0x140   : > { %v1200_v52 = vadd.f32 %v1199_v3, %v1072_v21  ;;  %v579_v21 = vld [vmem:[%s2086_s5 + $0x270] sm:$0xff] }
 0x141   : > { %v1094_v43 = vsel %vm966_vm14, %v579_v21, 0.0  ;;  %v595_v21 = vld [vmem:[%s2086_s5 + $0x2f0] sm:$0xff]  ;;  %vm982_vm14 = vcmp.lt.s32.totalorder %v3279_v58, 1500  ;;  %v3295_v58 = vld [vmem:[#allocation30_spill] sm:$0xff] }
 0x142   : > { %v1201_v46 = vadd.f32 %v1200_v52, %v1073_v22  ;;  %v580_v22 = vld [vmem:[%s2086_s5 + $0x278] sm:$0xff] }
 0x143   : > { %v1095_v44 = vsel %vm967_vm15, %v580_v22, 0.0  ;;  %v596_v22 = vld [vmem:[%s2086_s5 + $0x2f8] sm:$0xff]  ;;  %vm983_vm15 = vcmp.lt.s32.totalorder %v3280_v53, 1500  ;;  %v3296_v53 = vld [vmem:[#allocation31_spill] sm:$0xff] }
 0x144   : > { %v1202_v10 = vadd.f32 %v1201_v46, %v1074_v23  ;;  %v581_v23 = vld [vmem:[%s2086_s5 + $0x280] sm:$0xff] }
 0x146   : > { %v1203_v60 = vadd.f32 %v1202_v10, %v1075_v24  ;;  %v582_v24 = vld [vmem:[%s2086_s5 + $0x288] sm:$0xff] }
 0x147   : > { %v1097_v11 = vsel %vm969_vm1, %v582_v24, 0.0  ;;  %v598_v24 = vld [vmem:[%s2086_s5 + $0x308] sm:$0xff]  ;;  %vm985_vm1 = vcmp.lt.s32.totalorder %v3282_v62, 1500  ;;  %v3298_v62 = vld [vmem:[#allocation33_spill] sm:$0xff] }
 0x148   : > { %v1204_v55 = vadd.f32 %v1203_v60, %v1076_v25  ;;  %v1096_v25 = vsel %vm968_vm0, %v581_v23, 0.0  ;;  %v3267_v60 = vld [vmem:[#allocation49_spill] sm:$0xff]  ;;  %v597_v23 = vld [vmem:[%s2086_s5 + $0x300] sm:$0xff]  ;;  %vm984_vm0 = vcmp.lt.s32.totalorder %v3281_v9, 1500 }
 0x149   : > { %vm970_vm2 = vcmp.lt.s32.totalorder %v3267_v60, 1500  ;;  %v3283_v60 = vld [vmem:[#allocation18_spill] sm:$0xff]  ;;  %v3297_v9 = vld [vmem:[#allocation57_spill] sm:$0xff] }
 0x14a   : > { %v1205_v12 = vadd.f32 %v1204_v55, %v1077_v26  ;;  %v584_v55 = vld [vmem:[%s2086_s5 + $0x298] sm:$0xff] }
 0x14c   : > { %v1206_v1 = vadd.f32 %v1205_v12, %v1078_v27  ;;  %v3268_v27 = vld [vmem:[#allocation50_spill] sm:$0xff]  ;;  %v1098_v12 = vsel %vm970_vm2, %v583_v2, 0.0  ;;  %v599_v2 = vld [vmem:[%s2086_s5 + $0x310] sm:$0xff]  ;;  %vm986_vm2 = vcmp.lt.s32.totalorder %v3283_v60, 1500 }
 0x14d   : > { %vm971_vm3 = vcmp.lt.s32.totalorder %v3268_v27, 1500  ;;  %v3284_v27 = vld [vmem:[#allocation19_spill] sm:$0xff]  ;;  %v3299_v60 = vld [vmem:[#allocation34_spill] sm:$0xff] }
 0x14e   : > { %v1207_v63 = vadd.f32 %v1206_v1, %v1079_v28  ;;  %v585_v28 = vld [vmem:[%s2086_s5 + $0x2a0] sm:$0xff] }
 0x14f   : > { %v1100_v45 = vsel %vm972_vm4, %v585_v28, 0.0  ;;  %v601_v28 = vld [vmem:[%s2086_s5 + $0x320] sm:$0xff]  ;;  %vm988_vm4 = vcmp.lt.s32.totalorder %v3285_v5, 1500  ;;  %v3301_v5 = vld [vmem:[#allocation36_spill] sm:$0xff] }
 0x150   : > { %v1208_v14 = vadd.f32 %v1207_v63, %v1080_v29  ;;  %v1099_v29 = vsel %vm971_vm3, %v584_v55, 0.0  ;;  %v3270_v63 = vld [vmem:[#allocation52_spill] sm:$0xff]  ;;  %v600_v55 = vld [vmem:[%s2086_s5 + $0x318] sm:$0xff]  ;;  %vm987_vm3 = vcmp.lt.s32.totalorder %v3284_v27, 1500 }
 0x151   : > { %vm973_vm5 = vcmp.lt.s32.totalorder %v3270_v63, 1500  ;;  %v3286_v63 = vld [vmem:[#allocation21_spill] sm:$0xff]  ;;  %v3300_v27 = vld [vmem:[#allocation58_spill] sm:$0xff] }
 0x152   : > { %v1209_v54 = vadd.f32 %v1208_v14, %v1081_v30  ;;  %v587_v14 = vld [vmem:[%s2086_s5 + $0x2b0] sm:$0xff] }
 0x154   : > { %v1210_v6 = vadd.f32 %v1209_v54, %v1082_v31  ;;  %v3271_v31 = vld [vmem:[#allocation53_spill] sm:$0xff]  ;;  %v1101_v54 = vsel %vm973_vm5, %v586_v13, 0.0  ;;  %v602_v13 = vld [vmem:[%s2086_s5 + $0x328] sm:$0xff]  ;;  %vm989_vm5 = vcmp.lt.s32.totalorder %v3286_v63, 1500 }
 0x155   : > { %vm974_vm6 = vcmp.lt.s32.totalorder %v3271_v31, 1500  ;;  %v3287_v31 = vld [vmem:[#allocation22_spill] sm:$0xff]  ;;  %v3302_v63 = vld [vmem:[#allocation37_spill] sm:$0xff] }
 0x156   : > { %v1211_v16 = vadd.f32 %v1210_v6, %v1083_v32  ;;  %v588_v32 = vld [vmem:[%s2086_s5 + $0x2b8] sm:$0xff] }
 0x157   : > { %v1103_v51 = vsel %vm975_vm7, %v588_v32, 0.0  ;;  %v604_v32 = vld [vmem:[%s2086_s5 + $0x338] sm:$0xff]  ;;  %vm991_vm7 = vcmp.lt.s32.totalorder %v3288_v15, 1500  ;;  %v3304_v15 = vld [vmem:[#allocation39_spill] sm:$0xff] }
 0x158   : > { %v1212_v59 = vadd.f32 %v1211_v16, %v1084_v33  ;;  %v1102_v33 = vsel %vm974_vm6, %v587_v14, 0.0  ;;  %v3273_v16 = vld [vmem:[#allocation8_spill] sm:$0xff]  ;;  %vm990_vm6 = vcmp.lt.s32.totalorder %v3287_v31, 1500  ;;  %v3303_v31 = vld [vmem:[#allocation38_spill] sm:$0xff] }
 0x159   : > { %vm976_vm8 = vcmp.lt.s32.totalorder %v3273_v16, 1500  ;;  %v603_v14 = vld [vmem:[%s2086_s5 + $0x330] sm:$0xff] }
 0x15a   : > { %v1213_v61 = vadd.f32 %v1212_v59, %v1085_v34  ;;  %v590_v59 = vld [vmem:[%s2086_s5 + $0x2c8] sm:$0xff] }
 0x15b   : > { %v3289_v16 = vld [vmem:[#allocation24_spill] sm:$0xff] }
 0x15c   : > { %v1214_v18 = vadd.f32 %v1213_v61, %v1086_v35  ;;  %v3274_v35 = vld [vmem:[#allocation9_spill] sm:$0xff]  ;;  %v1104_v61 = vsel %vm976_vm8, %v589_v8, 0.0  ;;  %v605_v8 = vld [vmem:[%s2086_s5 + $0x340] sm:$0xff]  ;;  %vm992_vm8 = vcmp.lt.s32.totalorder %v3289_v16, 1500  ;;  %v3305_v16 = vld [vmem:[#allocation40_spill] sm:$0xff] }
 0x15d   : > { %vm977_vm9 = vcmp.lt.s32.totalorder %v3274_v35, 1500  ;;  %v3290_v35 = vld [vmem:[#allocation25_spill] sm:$0xff] }
 0x15e   : > { %v1215_v7 = vadd.f32 %v1214_v18, %v1087_v36  ;;  %v591_v36 = vld [vmem:[%s2086_s5 + $0x2d0] sm:$0xff] }
 0x15f   : > { %v1106_v19 = vsel %vm978_vm10, %v591_v36, 0.0  ;;  %v607_v36 = vld [vmem:[%s2086_s5 + $0x350] sm:$0xff]  ;;  %vm994_vm10 = vcmp.lt.s32.totalorder %v3291_v4, 1500  ;;  %v3307_v4 = vld [vmem:[#allocation42_spill] sm:$0xff] }
 0x160   : > { %v1216_v56 = vadd.f32 %v1215_v7, %v1088_v37  ;;  %v1105_v37 = vsel %vm977_vm9, %v590_v59, 0.0  ;;  %v3276_v7 = vld [vmem:[#allocation11_spill] sm:$0xff]  ;;  %vm993_vm9 = vcmp.lt.s32.totalorder %v3290_v35, 1500  ;;  %v3306_v35 = vld [vmem:[#allocation41_spill] sm:$0xff] }
 0x161   : > { %vm979_vm11 = vcmp.lt.s32.totalorder %v3276_v7, 1500  ;;  %v606_v59 = vld [vmem:[%s2086_s5 + $0x348] sm:$0xff] }
 0x162   : > { %v1217_v20 = vadd.f32 %v1216_v56, %v1089_v38  ;;  %v593_v56 = vld [vmem:[%s2086_s5 + $0x2e0] sm:$0xff] }
 0x163   : > { %v3292_v7 = vld [vmem:[#allocation27_spill] sm:$0xff] }
 0x164   : > { %v1218_v48 = vadd.f32 %v1217_v20, %v1090_v39  ;;  %v3277_v39 = vld [vmem:[#allocation12_spill] sm:$0xff]  ;;  %v1107_v20 = vsel %vm979_vm11, %v592_v57, 0.0  ;;  %v608_v57 = vld [vmem:[%s2086_s5 + $0x358] sm:$0xff]  ;;  %vm995_vm11 = vcmp.lt.s32.totalorder %v3292_v7, 1500  ;;  %v3308_v7 = vld [vmem:[#allocation59_spill] sm:$0xff] }
 0x165   : > { %vm980_vm12 = vcmp.lt.s32.totalorder %v3277_v39, 1500  ;;  %v3293_v39 = vld [vmem:[#allocation28_spill] sm:$0xff] }
 0x166   : > { %v1219_v3 = vadd.f32 %v1218_v48, %v1091_v40  ;;  %v594_v40 = vld [vmem:[%s2086_s5 + $0x2e8] sm:$0xff] }
 0x168   : > { %v1220_v52 = vadd.f32 %v1219_v3, %v1092_v41  ;;  %v1108_v41 = vsel %vm980_vm12, %v593_v56, 0.0  ;;  %v609_v56 = vld [vmem:[%s2086_s5 + $0x360] sm:$0xff]  ;;  %vm996_vm12 = vcmp.lt.s32.totalorder %v3293_v39, 1500 }
 0x169   : > { %v3309_v39 = vld [vmem:[#allocation43_spill] sm:$0xff] }
 0x16a   : > { %v1221_v46 = vadd.f32 %v1220_v52, %v1093_v42  ;;  %v1109_v42 = vsel %vm981_vm13, %v594_v40, 0.0  ;;  %v610_v40 = vld [vmem:[%s2086_s5 + $0x368] sm:$0xff]  ;;  %vm997_vm13 = vcmp.lt.s32.totalorder %v3294_v0, 1500 }
 0x16b   : > { %v3310_v0 = vld [vmem:[#allocation44_spill] sm:$0xff] }
 0x16c   : > { %v1222_v10 = vadd.f32 %v1221_v46, %v1094_v43  ;;  %v1110_v43 = vsel %vm982_vm14, %v595_v21, 0.0  ;;  %v611_v21 = vld [vmem:[%s2086_s5 + $0x370] sm:$0xff]  ;;  %vm998_vm14 = vcmp.lt.s32.totalorder %v3295_v58, 1500 }
 0x16d   : > { %v3311_v58 = vld [vmem:[#allocation60_spill] sm:$0xff] }
 0x16e   : > { %v1223_v26 = vadd.f32 %v1222_v10, %v1095_v44  ;;  %v1111_v44 = vsel %vm983_vm15, %v596_v22, 0.0  ;;  %v612_v22 = vld [vmem:[%s2086_s5 + $0x378] sm:$0xff]  ;;  %vm999_vm15 = vcmp.lt.s32.totalorder %v3296_v53, 1500 }
 0x16f   : > { %v3312_v53 = vld [vmem:[#allocation61_spill] sm:$0xff] }
 0x170   : > { %v1224_v49 = vadd.f32 %v1223_v26, %v1096_v25  ;;  %v1112_v25 = vsel %vm984_vm0, %v597_v23, 0.0  ;;  %v613_v23 = vld [vmem:[%s2086_s5 + $0x380] sm:$0xff]  ;;  %vm1000_vm0 = vcmp.lt.s32.totalorder %v3297_v9, 1500 }
 0x172   : > { %v1225_v1 = vadd.f32 %v1224_v49, %v1097_v11  ;;  %v1113_v11 = vsel %vm985_vm1, %v598_v24, 0.0  ;;  %v614_v24 = vld [vmem:[%s2086_s5 + $0x388] sm:$0xff]  ;;  %vm1001_vm1 = vcmp.lt.s32.totalorder %v3298_v62, 1500 }
 0x174   : > { %v1226_v30 = vadd.f32 %v1225_v1, %v1098_v12  ;;  %v1114_v12 = vsel %vm986_vm2, %v599_v2, 0.0  ;;  %v615_v2 = vld [vmem:[%s2086_s5 + $0x390] sm:$0xff]  ;;  %vm1002_vm2 = vcmp.lt.s32.totalorder %v3299_v60, 1500  ;;  %v1144_v60 = vld [vmem:[%s2090_s20] sm:$0x1] }
 0x176   : > { %v1227_v50 = vadd.f32 %v1226_v30, %v1099_v29  ;;  %v1115_v29 = vsel %vm987_vm3, %v600_v55, 0.0  ;;  %v616_v55 = vld [vmem:[%s2086_s5 + $0x398] sm:$0xff]  ;;  %vm1003_vm3 = vcmp.lt.s32.totalorder %v3300_v27, 1500 }
 0x178   : > { %v1228_v6 = vadd.f32 %v1227_v50, %v1100_v45  ;;  %v1116_v45 = vsel %vm988_vm4, %v601_v28, 0.0  ;;  %v617_v28 = vld [vmem:[%s2086_s5 + $0x3a0] sm:$0xff]  ;;  %vm1004_vm4 = vcmp.lt.s32.totalorder %v3301_v5, 1500 }
 0x17a   : > { %v1229_v34 = vadd.f32 %v1228_v6, %v1101_v54  ;;  %v1117_v54 = vsel %vm989_vm5, %v602_v13, 0.0  ;;  %v618_v13 = vld [vmem:[%s2086_s5 + $0x3a8] sm:$0xff]  ;;  %vm1005_vm5 = vcmp.lt.s32.totalorder %v3302_v63, 1500 }
 0x17c   : > { %v1230_v17 = vadd.f32 %v1229_v34, %v1102_v33  ;;  %v1118_v33 = vsel %vm990_vm6, %v603_v14, 0.0  ;;  %v619_v14 = vld [vmem:[%s2086_s5 + $0x3b0] sm:$0xff]  ;;  %vm1006_vm6 = vcmp.lt.s32.totalorder %v3303_v31, 1500 }
 0x17e   : > { %v1231_v18 = vadd.f32 %v1230_v17, %v1103_v51  ;;  %v1119_v51 = vsel %vm991_vm7, %v604_v32, 0.0  ;;  %v620_v32 = vld [vmem:[%s2086_s5 + $0x3b8] sm:$0xff]  ;;  %vm1007_vm7 = vcmp.lt.s32.totalorder %v3304_v15, 1500 }
 0x180   : > { %v1232_v38 = vadd.f32 %v1231_v18, %v1104_v61  ;;  %v1120_v61 = vsel %vm992_vm8, %v605_v8, 0.0  ;;  %v621_v8 = vld [vmem:[%s2086_s5 + $0x3c0] sm:$0xff]  ;;  %vm1008_vm8 = vcmp.lt.s32.totalorder %v3305_v16, 1500 }
 0x182   : > { %v1233_v47 = vadd.f32 %v1232_v38, %v1105_v37  ;;  %v1121_v37 = vsel %vm993_vm9, %v606_v59, 0.0  ;;  %v622_v59 = vld [vmem:[%s2086_s5 + $0x3c8] sm:$0xff]  ;;  %vm1009_vm9 = vcmp.lt.s32.totalorder %v3306_v35, 1500 }
 0x184   : > { %v1234_v48 = vadd.f32 %v1233_v47, %v1106_v19  ;;  %v1122_v19 = vsel %vm994_vm10, %v607_v36, 0.0  ;;  %v623_v36 = vld [vmem:[%s2086_s5 + $0x3d0] sm:$0xff]  ;;  %vm1010_vm10 = vcmp.lt.s32.totalorder %v3307_v4, 1500 }
 0x186   : > { %v1235_v3 = vadd.f32 %v1234_v48, %v1107_v20  ;;  %v1123_v20 = vsel %vm995_vm11, %v608_v57, 0.0  ;;  %v624_v57 = vld [vmem:[%s2086_s5 + $0x3d8] sm:$0xff]  ;;  %vm1011_vm11 = vcmp.lt.s32.totalorder %v3308_v7, 1500 }
 0x188   : > { %v1236_v52 = vadd.f32 %v1235_v3, %v1108_v41  ;;  %v1124_v41 = vsel %vm996_vm12, %v609_v56, 0.0  ;;  %v625_v56 = vld [vmem:[%s2086_s5 + $0x3e0] sm:$0xff]  ;;  %vm1012_vm12 = vcmp.lt.s32.totalorder %v3309_v39, 1500 }
 0x18a   : > { %v1237_v46 = vadd.f32 %v1236_v52, %v1109_v42  ;;  %v1125_v42 = vsel %vm997_vm13, %v610_v40, 0.0  ;;  %v626_v40 = vld [vmem:[%s2086_s5 + $0x3e8] sm:$0xff]  ;;  %vm1013_vm13 = vcmp.lt.s32.totalorder %v3310_v0, 1500 }
 0x18c   : > { %v1238_v10 = vadd.f32 %v1237_v46, %v1110_v43  ;;  %v1126_v43 = vsel %vm998_vm14, %v611_v21, 0.0  ;;  %v627_v21 = vld [vmem:[%s2086_s5 + $0x3f0] sm:$0xff]  ;;  %vm1014_vm14 = vcmp.lt.s32.totalorder %v3311_v58, 1500 }
 0x18e   : > { %v1239_v26 = vadd.f32 %v1238_v10, %v1111_v44  ;;  %v1127_v44 = vsel %vm999_vm15, %v612_v22, 0.0  ;;  %v628_v22 = vld [vmem:[%s2086_s5 + $0x3f8] sm:$0xff]  ;;  %vm1015_vm15 = vcmp.lt.s32.totalorder %v3312_v53, 1500 }
 0x18f   : > { %v1143_v9 = vsel %vm1015_vm15, %v628_v22, 0.0 }
 0x190   : > { %v1240_v49 = vadd.f32 %v1239_v26, %v1112_v25  ;;  %v1128_v25 = vsel %vm1000_vm0, %v613_v23, 0.0 }
 0x192   : > { %v1241_v1 = vadd.f32 %v1240_v49, %v1113_v11  ;;  %v1129_v11 = vsel %vm1001_vm1, %v614_v24, 0.0 }
 0x194   : > { %v1242_v30 = vadd.f32 %v1241_v1, %v1114_v12  ;;  %v1130_v12 = vsel %vm1002_vm2, %v615_v2, 0.0 }
 0x196   : > { %v1243_v50 = vadd.f32 %v1242_v30, %v1115_v29  ;;  %v1131_v29 = vsel %vm1003_vm3, %v616_v55, 0.0 }
 0x198   : > { %v1244_v6 = vadd.f32 %v1243_v50, %v1116_v45  ;;  %v1132_v45 = vsel %vm1004_vm4, %v617_v28, 0.0 }
 0x19a   : > { %v1245_v34 = vadd.f32 %v1244_v6, %v1117_v54  ;;  %v1133_v54 = vsel %vm1005_vm5, %v618_v13, 0.0 }
 0x19c   : > { %v1246_v17 = vadd.f32 %v1245_v34, %v1118_v33  ;;  %v1134_v33 = vsel %vm1006_vm6, %v619_v14, 0.0 }
 0x19e   : > { %v1247_v18 = vadd.f32 %v1246_v17, %v1119_v51  ;;  %v1135_v51 = vsel %vm1007_vm7, %v620_v32, 0.0 }
 0x1a0   : > { %v1248_v38 = vadd.f32 %v1247_v18, %v1120_v61  ;;  %v1136_v61 = vsel %vm1008_vm8, %v621_v8, 0.0 }
 0x1a2   : > { %v1249_v47 = vadd.f32 %v1248_v38, %v1121_v37  ;;  %v1137_v37 = vsel %vm1009_vm9, %v622_v59, 0.0 }
 0x1a4   : > { %v1250_v48 = vadd.f32 %v1249_v47, %v1122_v19  ;;  %v1138_v19 = vsel %vm1010_vm10, %v623_v36, 0.0 }
 0x1a6   : > { %v1251_v3 = vadd.f32 %v1250_v48, %v1123_v20  ;;  %v1139_v20 = vsel %vm1011_vm11, %v624_v57, 0.0 }
 0x1a8   : > { %v1252_v52 = vadd.f32 %v1251_v3, %v1124_v41  ;;  %v1140_v41 = vsel %vm1012_vm12, %v625_v56, 0.0 }
 0x1aa   : > { %v1253_v46 = vadd.f32 %v1252_v52, %v1125_v42  ;;  %v1141_v42 = vsel %vm1013_vm13, %v626_v40, 0.0 }
 0x1ac   : > { %v1254_v10 = vadd.f32 %v1253_v46, %v1126_v43  ;;  %v1142_v43 = vsel %vm1014_vm14, %v627_v21, 0.0 }
 0x1ae   : > { %v1255_v26 = vadd.f32 %v1254_v10, %v1127_v44 }
 0x1b0   : > { %v1256_v49 = vadd.f32 %v1255_v26, %v1128_v25 }
 0x1b2   : > { %v1257_v1 = vadd.f32 %v1256_v49, %v1129_v11 }
 0x1b4   : > { %v1258_v30 = vadd.f32 %v1257_v1, %v1130_v12 }
 0x1b6   : > { %v1259_v50 = vadd.f32 %v1258_v30, %v1131_v29 }
 0x1b8   : > { %v1260_v6 = vadd.f32 %v1259_v50, %v1132_v45 }
 0x1ba   : > { %v1261_v34 = vadd.f32 %v1260_v6, %v1133_v54 }
 0x1bc   : > { %v1262_v17 = vadd.f32 %v1261_v34, %v1134_v33 }
 0x1be   : > { %v1263_v18 = vadd.f32 %v1262_v17, %v1135_v51 }
 0x1c0   : > { %v1264_v38 = vadd.f32 %v1263_v18, %v1136_v61 }
 0x1c2   : > { %v1265_v47 = vadd.f32 %v1264_v38, %v1137_v37 }
 0x1c4   : > { %v1266_v48 = vadd.f32 %v1265_v47, %v1138_v19 }
 0x1c6   : > { %v1267_v3 = vadd.f32 %v1266_v48, %v1139_v20 }
 0x1c8   : > { %v1268_v52 = vadd.f32 %v1267_v3, %v1140_v41 }
 0x1ca   : > { %v1269_v23 = vadd.f32 %v1268_v52, %v1141_v42 }
 0x1cc   : > { %v1270_v46 = vadd.f32 %v1269_v23, %v1142_v43 }
 0x1ce   : > { %v1271_v44 = vadd.f32 %v1270_v46, %v1143_v9 }
 0x1d0   : > { %v1272_v24 = vrot.slane %v1271_v44, 4 }
 0x1d2   : > { %v1273_v62 = vadd.f32 %v1272_v24, %v1271_v44 }
 0x1d4   : > { %v1274_v10 = vrot.slane %v1273_v62, 2 }
 0x1d6   : > { %v1275_v25 = vadd.f32 %v1274_v10, %v1273_v62 }
 0x1d8   : > { %v1276_v2 = vrot.slane %v1275_v25, 1 }
 0x1da   : > { %v1277_v26 = vadd.f32 %v1276_v2, %v1275_v25 }
 0x1dc   : > { %v1278_v11 = vadd.f32 %v1277_v26, %v1144_v60 }
 0x1de   : > { %1279 = vst [vmem:[%s2090_s20] sm:$0x1] %v1278_v11 }
 0x1df   : > { %1610 = shalt.err (!%p1607_p6)
}
 0x1e0   : > { %s1611_s19 = scalar_lea.hbm %s3059_s3, 16  ;;  %s1615_s26 = scalar_lea.hbm %s3122_s1, 32 }
 0x1e1   : > { %p1612_p8 = scmp.ne.s32.totalorder %s3059_s3, %s1611_s19  ;;  %p1616_p11 = scmp.lt.u32.totalorder %s3059_s3, %s3122_s1 }
 0x1e2   : > { %p1617_p13 = scmp.lt.u32.totalorder %s1615_s26, %s1611_s19  ;;  %p1619_p1 = scmp.lt.u32.totalorder %s1611_s19, %s3059_s3 }
 0x1e3   : > { %p1613_p9 = pnand %p1612_p8, %p1857_p7 }
 0x1e4   : > { %p1618_p0 = por %p1617_p13, %p1616_p11 }
 0x1e5   : > { %p1614_p10 = pneg %p1613_p9 }
 0x1e6   : > { %p1620_p2 = por %p1619_p1, %p1618_p0 }
 0x1e8   : > { %p1621_p3 = pnand %p1620_p2, %p1614_p10 }
 0x1ea   : > { %1624 = shalt.err (!%p1621_p3)
}
 0x1eb   : > { %1445 = dma.vmem_to_hbm [thread:$0]  (%p1857_p7), %s3061_s11, 16, %s3059_s3, %s1281_s16  }
 0x1ec PF: > { %p1451_p4 = scmp.ge.s32.totalorder %s1739_s15, 2  ;;  %s1305_s20 = sand.u32 1, %s1703_s6  }
 0x1ed   : > { %s1306_s0 = scalar_lea.sflag [#allocation4], %s1305_s20 }
 0x1ee   : > { %p1448_p5 = pnand %p1451_p4, %p1865_p12 }
 0x1f0   : > { %1698 = dma.done.wait (!%p1448_p5), %s1306_s0, 16  }
 0x1f1   : > { %1700 = vsyncadd (!%p1448_p5), %s1306_s0, 4294967280  ;;  %s14_s15 = sadd.s32 1, %s1739_s15   ;;  %s3313_s24 = sld [smem:[#allocation6_spill]] }
 0x1f2   : > { %p11_p6 = scmp.ge.s32.totalorder %s14_s15, 6   ;;  %s3314_s6 = smov %s1707_s7 }
 0x1f3   : > { %s3315_s7 = smov %s1711_s8  ;;  %s3316_s8 = smov %s1870_s28 }
 0x1f4   : > { %s3317_s9 = smov %s1719_s10  ;;  %s3318_s10 = smov %s1873_s29 }
 0x1f5   : > { %s3319_s11 = smov %s1731_s13  ;;  %s3320_s12 = smov %s1735_s14 }
 0x1f6   : > { %s3321_s13 = smov %s3324_s18  ;;  %13 = sbr.rel (!%p11_p6) target bundleno = 8 (0x8), region = 150 }
 0x1f7   : > { %s3322_s14 = smov %s3313_s24 }
 0x1fd   :  { %1310 = vsyncpa [#allocation4], 1 }
 0x1fe   :  { %1312 = vsyncpa [#allocation4 + $0x1], 1 }

</bundles_post_ra>
